<compile_context>
chip_gen: v7x
topology: tpu7x:2x2x1
jax: 0.10.0
libtpu: 0.0.40
codegen_flags: <defaults>
</compile_context>

<pallas_src>
import functools

import jax
import jax.numpy as jnp
from jax.experimental import pallas as pl
from jax.experimental.pallas import tpu as pltpu


def _round_up(x, m):
    return (x + m - 1) // m * m


def _pad_last(a, n):
    """Zero-pad the last axis of `a` up to length n."""
    return jnp.pad(a, [(0, 0)] * (a.ndim - 1) + [(0, n - a.shape[-1])])


# ---------------------------------------------------------------------------
# Fused BasicBlock kernel (one image per grid step)
# ---------------------------------------------------------------------------
def _make_block_kernel(KH, KW, stride, pad, Ho, Wo, Cin, Cp):
    s = stride
    M = Ho * Wo

    def kernel(x_ref, w1_ref, w2_ref, ws_ref, bn_ref, o_ref, h1pad_ref):
        # x_ref  : (s*s, R, Cc, Cin)  stride-phase views of the zero-padded input
        # w1_ref : (KH*KW, Cin, Cp)   conv1 weight per tap (Cout zero-padded to Cp)
        # w2_ref : (KH*KW, Cp, Cp)    conv2 weight per tap (both channel dims padded)
        # ws_ref : (Cin, Cp)          1x1 shortcut weight (eye() when shortcut is identity)
        # bn_ref : (6, Cp) f32        rows: s1, b1, s2, b2, s_sc, b_sc (padded cols = 0)
        # o_ref  : (Ho, Wo, Cp) f32   lane-dense output block
        # h1pad  : (Ho+2p, Wo+2p, Cp) VMEM scratch: conv1 output with zero halo

        # ---- conv1 (stride s, pad) + bn1 + relu: 9 tap dots, f32 accumulate
        acc = jnp.zeros((M, Cp), jnp.float32)
        for kh in range(KH):
            for kw in range(KW):
                p = (kh % s) * s + (kw % s)
                win = x_ref[p, pl.ds(kh // s, Ho), pl.ds(kw // s, Wo), :]
                acc = acc + jnp.dot(win.reshape(M, Cin), w1_ref[kh * KW + kw],
                                    preferred_element_type=jnp.float32)
        h1 = jnp.maximum(acc * bn_ref[0:1, :] + bn_ref[1:2, :], 0.0)

        # ---- stage h1 with a zero halo in VMEM; it never goes to HBM
        h1pad_ref[...] = jnp.zeros_like(h1pad_ref)
        h1pad_ref[pl.ds(pad, Ho), pl.ds(pad, Wo), :] = (
            h1.reshape(Ho, Wo, Cp).astype(h1pad_ref.dtype))

        # ---- conv2 (stride 1, pad) + bn2
        acc2 = jnp.zeros((M, Cp), jnp.float32)
        for kh in range(KH):
            for kw in range(KW):
                win = h1pad_ref[pl.ds(kh, Ho), pl.ds(kw, Wo), :]
                acc2 = acc2 + jnp.dot(win.reshape(M, Cp), w2_ref[kh * KW + kw],
                                      preferred_element_type=jnp.float32)
        out = acc2 * bn_ref[2:3, :] + bn_ref[3:4, :]

        # ---- fused shortcut: 1x1 conv (+ folded BN) on the stride-sampled input.
        #      Identity shortcut uses an eye() weight with scale=1, bias=0.
        ps = (pad % s) * s + (pad % s)
        xw = x_ref[ps, pl.ds(pad // s, Ho), pl.ds(pad // s, Wo), :]
        sc = jnp.dot(xw.reshape(M, Cin), ws_ref[...],
                     preferred_element_type=jnp.float32)
        out = out + sc * bn_ref[4:5, :] + bn_ref[5:6, :]

        # ---- residual relu, lane-dense store (Cp is a multiple of 128)
        o_ref[...] = jnp.maximum(out, 0.0).reshape(Ho, Wo, Cp).astype(o_ref.dtype)

    return kernel


# ---------------------------------------------------------------------------
# Wrapper glue
# ---------------------------------------------------------------------------
def _phase_decompose(x_nhwc, KH, KW, stride, pad, Ho, Wo, dtype):
    """Split the zero-padded input into stride x stride phases so every conv tap
    (and the strided 1x1 shortcut) becomes a unit-stride static slice in-kernel.
    Total HBM bytes ~= one copy of the (padded) input -- no 9x im2col expansion."""
    N, H, W, C = x_nhwc.shape
    s = stride
    R = (KH - 1) // s + Ho
    Cc = (KW - 1) // s + Wo
    hp = max(s * R, H + 2 * pad)
    wp = max(s * Cc, W + 2 * pad)
    xp = jnp.pad(x_nhwc, ((0, 0), (pad, hp - H - pad), (pad, wp - W - pad), (0, 0)))
    phases = []
    for a in range(s):
        for b in range(s):
            phases.append(xp[:, a::s, b::s, :][:, :R, :Cc, :])
    return jnp.stack(phases, axis=1).astype(dtype), R, Cc  # (N, s*s, R, Cc, C)


def basic_block_forward(x_nchw, params, stride, *, compute_dtype=jnp.float32):
    """Forward of the PyTorch BasicBlock (eval-mode BN), NCHW in / NCHW out."""
    x = jnp.transpose(x_nchw, (0, 2, 3, 1)).astype(jnp.float32)  # NCHW -> NHWC
    N, H, W, Cin = x.shape
    KH, KW, _, planes = params["w1"].shape
    assert KH == 3 and KW == 3, "padding=1 residual shapes require kernel_size=3"
    pad = 1
    s = stride
    Ho = (H + 2 * pad - KH) // s + 1
    Wo = (W + 2 * pad - KW) // s + 1
    Cp = _round_up(planes, 128)  # lane-dense output channel dim

    xph, R, Cc = _phase_decompose(x, KH, KW, s, pad, Ho, Wo, compute_dtype)
    PH = s * s

    # Weights: HWIO -> per-tap (tap, Cin, Cout), zero-padded to Cp on the output side.
    w1 = _pad_last(params["w1"].reshape(KH * KW, Cin, planes), Cp).astype(compute_dtype)
    w2 = jnp.pad(params["w2"].reshape(KH * KW, planes, planes),
                 ((0, 0), (0, Cp - planes), (0, Cp - planes))).astype(compute_dtype)

    has_projection = (s != 1) or (Cin != planes)
    if has_projection:
        ws = _pad_last(params["ws"].reshape(Cin, planes), Cp)
        s_sc, b_sc = params["s_s"], params["b_s"]
    else:
        ws = jnp.eye(Cin, Cp, dtype=jnp.float32)  # identity shortcut as a 1x1 "conv"
        s_sc = jnp.ones((planes,), jnp.float32)
        b_sc = jnp.zeros((planes,), jnp.float32)
    ws = ws.astype(compute_dtype)

    # Folded BN affines (f32 epilogue). Padded columns are 0 -> padded channels stay 0.
    bn = jnp.stack([
        _pad_last(params["s1"], Cp), _pad_last(params["b1"], Cp),
        _pad_last(params["s2"], Cp), _pad_last(params["b2"], Cp),
        _pad_last(s_sc, Cp), _pad_last(b_sc, Cp),
    ]).astype(jnp.float32)  # (6, Cp)

    kernel = _make_block_kernel(KH, KW, s, pad, Ho, Wo, Cin, Cp)

    out = pl.pallas_call(
        kernel,
        out_shape=jax.ShapeDtypeStruct((N, Ho, Wo, Cp), jnp.float32),
        grid=(N,),  # one image per step; >=2 steps keeps both v7x TCs busy
        in_specs=[
            pl.BlockSpec((None, PH, R, Cc, Cin), lambda n: (n, 0, 0, 0, 0)),
            pl.BlockSpec((KH * KW, Cin, Cp), lambda n: (0, 0, 0)),
            pl.BlockSpec((KH * KW, Cp, Cp), lambda n: (0, 0, 0)),
            pl.BlockSpec((Cin, Cp), lambda n: (0, 0)),
            pl.BlockSpec((6, Cp), lambda n: (0, 0)),
        ],
        out_specs=pl.BlockSpec((None, Ho, Wo, Cp), lambda n: (n, 0, 0, 0)),
        scratch_shapes=[pltpu.VMEM((Ho + 2 * pad, Wo + 2 * pad, Cp), compute_dtype)],
        compiler_params=pltpu.CompilerParams(dimension_semantics=("parallel",)),
    )(xph, w1, w2, ws, bn)

    out = out[:, :, :, :planes]                  # drop lane padding
    return jnp.transpose(out, (0, 3, 1, 2))      # NHWC -> NCHW


# ---------------------------------------------------------------------------
# Deterministic parameter init + pure-JAX reference for verification
# ---------------------------------------------------------------------------
def make_params(key, in_planes, planes, kernel_size):
    eps = 1e-5

    def bn_fold(kg, kb, km, kv, c):
        gamma = 1.0 + 0.1 * jax.random.normal(kg, (c,), jnp.float32)
        beta = 0.1 * jax.random.normal(kb, (c,), jnp.float32)
        mean = 0.1 * jax.random.normal(km, (c,), jnp.float32)
        var = 1.0 + 0.1 * jnp.abs(jax.random.normal(kv, (c,), jnp.float32))
        scale = gamma / jnp.sqrt(var + eps)
        bias = beta - mean * scale
        return scale, bias

    ks = jax.random.split(key, 15)
    # Conv weights stored HWIO (== torch (O,I,KH,KW) permuted to (KH,KW,I,O)).
    w1 = 0.1 * jax.random.normal(ks[0], (kernel_size, kernel_size, in_planes, planes), jnp.float32)
    w2 = 0.1 * jax.random.normal(ks[1], (kernel_size, kernel_size, planes, planes), jnp.float32)
    ws = 0.1 * jax.random.normal(ks[2], (1, 1, in_planes, planes), jnp.float32)
    s1, b1 = bn_fold(ks[3], ks[4], ks[5], ks[6], planes)
    s2, b2 = bn_fold(ks[7], ks[8], ks[9], ks[10], planes)
    s_s, b_s = bn_fold(ks[11], ks[12], ks[13], ks[14], planes)
    return dict(w1=w1, w2=w2, ws=ws, s1=s1, b1=b1, s2=s2, b2=b2, s_s=s_s, b_s=b_s)


def _conv2d_ref(x, w, stride, pad):
    return jax.lax.conv_general_dilated(
        x, w, window_strides=(stride, stride),
        padding=[(pad, pad), (pad, pad)],
        dimension_numbers=("NHWC", "HWIO", "NHWC"),
    )


def basic_block_ref(x_nchw, p, stride):
    x = jnp.transpose(x_nchw, (0, 2, 3, 1)).astype(jnp.float32)
    h = jnp.maximum(_conv2d_ref(x, p["w1"], stride, 1) * p["s1"] + p["b1"], 0.0)
    h = _conv2d_ref(h, p["w2"], 1, 1) * p["s2"] + p["b2"]
    if stride != 1 or x.shape[-1] != p["w1"].shape[-1]:
        sc = _conv2d_ref(x, p["ws"], stride, 0) * p["s_s"] + p["b_s"]
    else:
        sc = x
    out = jnp.maximum(h + sc, 0.0)
    return jnp.transpose(out, (0, 3, 1, 2))


if __name__ == "__main__":
    key = jax.random.PRNGKey(0)
    kx1, kp1, kx2, kp2 = jax.random.split(key, 4)

    # Case 1: projection shortcut (stride=2, in_planes != planes), like the PyTorch spec.
    in_planes, planes, ksz, stride = 4, 8, 3, 2
    x = jax.random.normal(kx1, (2, in_planes, 16, 16), jnp.float32)  # NCHW, as PyTorch
    params = make_params(kp1, in_planes, planes, ksz)

    fwd = jax.jit(functools.partial(basic_block_forward, stride=stride))
    out = jax.block_until_ready(fwd(x, params))
    ref = basic_block_ref(x, params, stride)
    assert out.shape == ref.shape == (2, planes, 8, 8), out.shape
    assert jnp.allclose(out, ref, atol=2e-4, rtol=2e-4), \
        float(jnp.max(jnp.abs(out - ref)))

    # Case 1b: bf16 MXU operands (v6e/v7x fast path), f32 epilogue and output.
    fwd_bf16 = jax.jit(functools.partial(basic_block_forward, stride=stride,
                                         compute_dtype=jnp.bfloat16))
    out_bf = jax.block_until_ready(fwd_bf16(x, params))
    rel = jnp.sqrt(jnp.mean((out_bf - ref) ** 2)) / (jnp.sqrt(jnp.mean(ref ** 2)) + 1e-12)
    assert float(rel) < 5e-2, float(rel)

    # Case 2: identity shortcut (stride=1, in_planes == planes).
    in_planes2, planes2, stride2 = 8, 8, 1
    x2 = jax.random.normal(kx2, (2, in_planes2, 16, 16), jnp.float32)
    params2 = make_params(kp2, in_planes2, planes2, 3)
    fwd2 = jax.jit(functools.partial(basic_block_forward, stride=stride2))
    out2 = jax.block_until_ready(fwd2(x2, params2))
    ref2 = basic_block_ref(x2, params2, stride2)
    assert out2.shape == ref2.shape == (2, planes2, 16, 16), out2.shape
    assert jnp.allclose(out2, ref2, atol=2e-4, rtol=2e-4), \
        float(jnp.max(jnp.abs(out2 - ref2)))

    print("KERNEL_OK")
</pallas_src>

<mosaic_0001>
module attributes {stable_mosaic.version = 11 : i64} {
  func.func @kernel(%arg0: i32, %arg1: memref<1x4x9x9x4xf32, #tpu.memory_space<vmem>>, %arg2: memref<9x4x128xf32, #tpu.memory_space<vmem>>, %arg3: memref<9x128x128xf32, #tpu.memory_space<vmem>>, %arg4: memref<4x128xf32, #tpu.memory_space<vmem>>, %arg5: memref<6x128xf32, #tpu.memory_space<vmem>>, %arg6: memref<1x8x8x128xf32, #tpu.memory_space<vmem>>, %arg7: memref<10x10x128xf32, #tpu.memory_space<vmem>>) attributes {dimension_semantics = [#tpu.dimension_semantics<parallel>], iteration_bounds = array<i64: 2>, scalar_prefetch = 0 : i64, scratch_operands = 1 : i64, tpu.core_type = #tpu.core_type<tc>, window_params = [{transform_indices = @transform_0, window_bounds = array<i64: 1, 4, 9, 9, 4>}, {pipeline_mode = #tpu.pipeline_mode<synchronous>, transform_indices = @transform_1, window_bounds = array<i64: 9, 4, 128>}, {pipeline_mode = #tpu.pipeline_mode<synchronous>, transform_indices = @transform_2, window_bounds = array<i64: 9, 128, 128>}, {pipeline_mode = #tpu.pipeline_mode<synchronous>, transform_indices = @transform_3, window_bounds = array<i64: 4, 128>}, {pipeline_mode = #tpu.pipeline_mode<synchronous>, transform_indices = @transform_4, window_bounds = array<i64: 6, 128>}, {transform_indices = @transform_5, window_bounds = array<i64: 1, 8, 8, 128>}]} {
    %cst = arith.constant 0.000000e+00 : f32
    %0 = vector.broadcast %cst : f32 to vector<64x128xf32>
    %c0 = arith.constant 0 : index
    %c0_0 = arith.constant 0 : index
    %c0_1 = arith.constant 0 : index
    %c0_2 = arith.constant 0 : index
    %c0_3 = arith.constant 0 : index
    %1 = vector.load %arg1[%c0, %c0_0, %c0_1, %c0_2, %c0_3] : memref<1x4x9x9x4xf32, #tpu.memory_space<vmem>>, vector<1x1x8x8x4xf32>
    %2 = vector.shape_cast %1 : vector<1x1x8x8x4xf32> to vector<8x8x4xf32>
    %3 = vector.shape_cast %2 : vector<8x8x4xf32> to vector<64x4xf32>
    %c0_4 = arith.constant 0 : index
    %c0_5 = arith.constant 0 : index
    %c0_6 = arith.constant 0 : index
    %4 = vector.load %arg2[%c0_4, %c0_5, %c0_6] : memref<9x4x128xf32, #tpu.memory_space<vmem>>, vector<1x4x128xf32>
    %5 = vector.shape_cast %4 : vector<1x4x128xf32> to vector<4x128xf32>
    %cst_7 = arith.constant dense<0.000000e+00> : vector<64x128xf32>
    %6 = tpu.matmul %3, %5, %cst_7 {dimension_numbers = #tpu.dot_dimension_numbers<[1], [0], [0], [1], [0, 0, 1, 1], [], []>} : vector<64x4xf32>, vector<4x128xf32>, vector<64x128xf32> -> vector<64x128xf32>
    %7 = arith.addf %0, %6 : vector<64x128xf32>
    %c0_8 = arith.constant 0 : index
    %c1 = arith.constant 1 : index
    %c0_9 = arith.constant 0 : index
    %c0_10 = arith.constant 0 : index
    %c0_11 = arith.constant 0 : index
    %8 = vector.load %arg1[%c0_8, %c1, %c0_9, %c0_10, %c0_11] : memref<1x4x9x9x4xf32, #tpu.memory_space<vmem>>, vector<1x1x8x8x4xf32>
    %9 = vector.shape_cast %8 : vector<1x1x8x8x4xf32> to vector<8x8x4xf32>
    %10 = vector.shape_cast %9 : vector<8x8x4xf32> to vector<64x4xf32>
    %c1_12 = arith.constant 1 : index
    %c0_13 = arith.constant 0 : index
    %c0_14 = arith.constant 0 : index
    %11 = vector.load %arg2[%c1_12, %c0_13, %c0_14] : memref<9x4x128xf32, #tpu.memory_space<vmem>>, vector<1x4x128xf32>
    %12 = vector.shape_cast %11 : vector<1x4x128xf32> to vector<4x128xf32>
    %cst_15 = arith.constant dense<0.000000e+00> : vector<64x128xf32>
    %13 = tpu.matmul %10, %12, %cst_15 {dimension_numbers = #tpu.dot_dimension_numbers<[1], [0], [0], [1], [0, 0, 1, 1], [], []>} : vector<64x4xf32>, vector<4x128xf32>, vector<64x128xf32> -> vector<64x128xf32>
    %14 = arith.addf %7, %13 : vector<64x128xf32>
    %c0_16 = arith.constant 0 : index
    %c0_17 = arith.constant 0 : index
    %c0_18 = arith.constant 0 : index
    %c1_19 = arith.constant 1 : index
    %c0_20 = arith.constant 0 : index
    %15 = vector.load %arg1[%c0_16, %c0_17, %c0_18, %c1_19, %c0_20] : memref<1x4x9x9x4xf32, #tpu.memory_space<vmem>>, vector<1x1x8x8x4xf32>
    %16 = vector.shape_cast %15 : vector<1x1x8x8x4xf32> to vector<8x8x4xf32>
    %17 = vector.shape_cast %16 : vector<8x8x4xf32> to vector<64x4xf32>
    %c2 = arith.constant 2 : index
    %c0_21 = arith.constant 0 : index
    %c0_22 = arith.constant 0 : index
    %18 = vector.load %arg2[%c2, %c0_21, %c0_22] : memref<9x4x128xf32, #tpu.memory_space<vmem>>, vector<1x4x128xf32>
    %19 = vector.shape_cast %18 : vector<1x4x128xf32> to vector<4x128xf32>
    %cst_23 = arith.constant dense<0.000000e+00> : vector<64x128xf32>
    %20 = tpu.matmul %17, %19, %cst_23 {dimension_numbers = #tpu.dot_dimension_numbers<[1], [0], [0], [1], [0, 0, 1, 1], [], []>} : vector<64x4xf32>, vector<4x128xf32>, vector<64x128xf32> -> vector<64x128xf32>
    %21 = arith.addf %14, %20 : vector<64x128xf32>
    %c0_24 = arith.constant 0 : index
    %c2_25 = arith.constant 2 : index
    %c0_26 = arith.constant 0 : index
    %c0_27 = arith.constant 0 : index
    %c0_28 = arith.constant 0 : index
    %22 = vector.load %arg1[%c0_24, %c2_25, %c0_26, %c0_27, %c0_28] : memref<1x4x9x9x4xf32, #tpu.memory_space<vmem>>, vector<1x1x8x8x4xf32>
    %23 = vector.shape_cast %22 : vector<1x1x8x8x4xf32> to vector<8x8x4xf32>
    %24 = vector.shape_cast %23 : vector<8x8x4xf32> to vector<64x4xf32>
    %c3 = arith.constant 3 : index
    %c0_29 = arith.constant 0 : index
    %c0_30 = arith.constant 0 : index
    %25 = vector.load %arg2[%c3, %c0_29, %c0_30] : memref<9x4x128xf32, #tpu.memory_space<vmem>>, vector<1x4x128xf32>
    %26 = vector.shape_cast %25 : vector<1x4x128xf32> to vector<4x128xf32>
    %cst_31 = arith.constant dense<0.000000e+00> : vector<64x128xf32>
    %27 = tpu.matmul %24, %26, %cst_31 {dimension_numbers = #tpu.dot_dimension_numbers<[1], [0], [0], [1], [0, 0, 1, 1], [], []>} : vector<64x4xf32>, vector<4x128xf32>, vector<64x128xf32> -> vector<64x128xf32>
    %28 = arith.addf %21, %27 : vector<64x128xf32>
    %c0_32 = arith.constant 0 : index
    %c3_33 = arith.constant 3 : index
    %c0_34 = arith.constant 0 : index
    %c0_35 = arith.constant 0 : index
    %c0_36 = arith.constant 0 : index
    %29 = vector.load %arg1[%c0_32, %c3_33, %c0_34, %c0_35, %c0_36] : memref<1x4x9x9x4xf32, #tpu.memory_space<vmem>>, vector<1x1x8x8x4xf32>
    %30 = vector.shape_cast %29 : vector<1x1x8x8x4xf32> to vector<8x8x4xf32>
    %31 = vector.shape_cast %30 : vector<8x8x4xf32> to vector<64x4xf32>
    %c4 = arith.constant 4 : index
    %c0_37 = arith.constant 0 : index
    %c0_38 = arith.constant 0 : index
    %32 = vector.load %arg2[%c4, %c0_37, %c0_38] : memref<9x4x128xf32, #tpu.memory_space<vmem>>, vector<1x4x128xf32>
    %33 = vector.shape_cast %32 : vector<1x4x128xf32> to vector<4x128xf32>
    %cst_39 = arith.constant dense<0.000000e+00> : vector<64x128xf32>
    %34 = tpu.matmul %31, %33, %cst_39 {dimension_numbers = #tpu.dot_dimension_numbers<[1], [0], [0], [1], [0, 0, 1, 1], [], []>} : vector<64x4xf32>, vector<4x128xf32>, vector<64x128xf32> -> vector<64x128xf32>
    %35 = arith.addf %28, %34 : vector<64x128xf32>
    %c0_40 = arith.constant 0 : index
    %c2_41 = arith.constant 2 : index
    %c0_42 = arith.constant 0 : index
    %c1_43 = arith.constant 1 : index
    %c0_44 = arith.constant 0 : index
    %36 = vector.load %arg1[%c0_40, %c2_41, %c0_42, %c1_43, %c0_44] : memref<1x4x9x9x4xf32, #tpu.memory_space<vmem>>, vector<1x1x8x8x4xf32>
    %37 = vector.shape_cast %36 : vector<1x1x8x8x4xf32> to vector<8x8x4xf32>
    %38 = vector.shape_cast %37 : vector<8x8x4xf32> to vector<64x4xf32>
    %c5 = arith.constant 5 : index
    %c0_45 = arith.constant 0 : index
    %c0_46 = arith.constant 0 : index
    %39 = vector.load %arg2[%c5, %c0_45, %c0_46] : memref<9x4x128xf32, #tpu.memory_space<vmem>>, vector<1x4x128xf32>
    %40 = vector.shape_cast %39 : vector<1x4x128xf32> to vector<4x128xf32>
    %cst_47 = arith.constant dense<0.000000e+00> : vector<64x128xf32>
    %41 = tpu.matmul %38, %40, %cst_47 {dimension_numbers = #tpu.dot_dimension_numbers<[1], [0], [0], [1], [0, 0, 1, 1], [], []>} : vector<64x4xf32>, vector<4x128xf32>, vector<64x128xf32> -> vector<64x128xf32>
    %42 = arith.addf %35, %41 : vector<64x128xf32>
    %c0_48 = arith.constant 0 : index
    %c0_49 = arith.constant 0 : index
    %c1_50 = arith.constant 1 : index
    %c0_51 = arith.constant 0 : index
    %c0_52 = arith.constant 0 : index
    %43 = vector.load %arg1[%c0_48, %c0_49, %c1_50, %c0_51, %c0_52] : memref<1x4x9x9x4xf32, #tpu.memory_space<vmem>>, vector<1x1x8x8x4xf32>
    %44 = vector.shape_cast %43 : vector<1x1x8x8x4xf32> to vector<8x8x4xf32>
    %45 = vector.shape_cast %44 : vector<8x8x4xf32> to vector<64x4xf32>
    %c6 = arith.constant 6 : index
    %c0_53 = arith.constant 0 : index
    %c0_54 = arith.constant 0 : index
    %46 = vector.load %arg2[%c6, %c0_53, %c0_54] : memref<9x4x128xf32, #tpu.memory_space<vmem>>, vector<1x4x128xf32>
    %47 = vector.shape_cast %46 : vector<1x4x128xf32> to vector<4x128xf32>
    %cst_55 = arith.constant dense<0.000000e+00> : vector<64x128xf32>
    %48 = tpu.matmul %45, %47, %cst_55 {dimension_numbers = #tpu.dot_dimension_numbers<[1], [0], [0], [1], [0, 0, 1, 1], [], []>} : vector<64x4xf32>, vector<4x128xf32>, vector<64x128xf32> -> vector<64x128xf32>
    %49 = arith.addf %42, %48 : vector<64x128xf32>
    %c0_56 = arith.constant 0 : index
    %c1_57 = arith.constant 1 : index
    %c1_58 = arith.constant 1 : index
    %c0_59 = arith.constant 0 : index
    %c0_60 = arith.constant 0 : index
    %50 = vector.load %arg1[%c0_56, %c1_57, %c1_58, %c0_59, %c0_60] : memref<1x4x9x9x4xf32, #tpu.memory_space<vmem>>, vector<1x1x8x8x4xf32>
    %51 = vector.shape_cast %50 : vector<1x1x8x8x4xf32> to vector<8x8x4xf32>
    %52 = vector.shape_cast %51 : vector<8x8x4xf32> to vector<64x4xf32>
    %c7 = arith.constant 7 : index
    %c0_61 = arith.constant 0 : index
    %c0_62 = arith.constant 0 : index
    %53 = vector.load %arg2[%c7, %c0_61, %c0_62] : memref<9x4x128xf32, #tpu.memory_space<vmem>>, vector<1x4x128xf32>
    %54 = vector.shape_cast %53 : vector<1x4x128xf32> to vector<4x128xf32>
    %cst_63 = arith.constant dense<0.000000e+00> : vector<64x128xf32>
    %55 = tpu.matmul %52, %54, %cst_63 {dimension_numbers = #tpu.dot_dimension_numbers<[1], [0], [0], [1], [0, 0, 1, 1], [], []>} : vector<64x4xf32>, vector<4x128xf32>, vector<64x128xf32> -> vector<64x128xf32>
    %56 = arith.addf %49, %55 : vector<64x128xf32>
    %c0_64 = arith.constant 0 : index
    %c0_65 = arith.constant 0 : index
    %c1_66 = arith.constant 1 : index
    %c1_67 = arith.constant 1 : index
    %c0_68 = arith.constant 0 : index
    %57 = vector.load %arg1[%c0_64, %c0_65, %c1_66, %c1_67, %c0_68] : memref<1x4x9x9x4xf32, #tpu.memory_space<vmem>>, vector<1x1x8x8x4xf32>
    %58 = vector.shape_cast %57 : vector<1x1x8x8x4xf32> to vector<8x8x4xf32>
    %59 = vector.shape_cast %58 : vector<8x8x4xf32> to vector<64x4xf32>
    %c8 = arith.constant 8 : index
    %c0_69 = arith.constant 0 : index
    %c0_70 = arith.constant 0 : index
    %60 = vector.load %arg2[%c8, %c0_69, %c0_70] : memref<9x4x128xf32, #tpu.memory_space<vmem>>, vector<1x4x128xf32>
    %61 = vector.shape_cast %60 : vector<1x4x128xf32> to vector<4x128xf32>
    %cst_71 = arith.constant dense<0.000000e+00> : vector<64x128xf32>
    %62 = tpu.matmul %59, %61, %cst_71 {dimension_numbers = #tpu.dot_dimension_numbers<[1], [0], [0], [1], [0, 0, 1, 1], [], []>} : vector<64x4xf32>, vector<4x128xf32>, vector<64x128xf32> -> vector<64x128xf32>
    %63 = arith.addf %56, %62 : vector<64x128xf32>
    %c0_72 = arith.constant 0 : index
    %c0_73 = arith.constant 0 : index
    %64 = vector.load %arg5[%c0_72, %c0_73] : memref<6x128xf32, #tpu.memory_space<vmem>>, vector<1x128xf32>
    %65 = vector.broadcast %64 : vector<1x128xf32> to vector<64x128xf32>
    %66 = arith.mulf %63, %65 : vector<64x128xf32>
    %c1_74 = arith.constant 1 : index
    %c0_75 = arith.constant 0 : index
    %67 = vector.load %arg5[%c1_74, %c0_75] : memref<6x128xf32, #tpu.memory_space<vmem>>, vector<1x128xf32>
    %68 = vector.broadcast %67 : vector<1x128xf32> to vector<64x128xf32>
    %69 = arith.addf %66, %68 : vector<64x128xf32>
    %cst_76 = arith.constant 0.000000e+00 : f32
    %70 = vector.broadcast %cst_76 : f32 to vector<64x128xf32>
    %71 = arith.maximumf %69, %70 : vector<64x128xf32>
    %cst_77 = arith.constant 0.000000e+00 : f32
    %72 = vector.broadcast %cst_77 : f32 to vector<10x10x128xf32>
    %c0_78 = arith.constant 0 : index
    %c0_79 = arith.constant 0 : index
    %c0_80 = arith.constant 0 : index
    %73 = vector.load %arg7[%c0_78, %c0_79, %c0_80] : memref<10x10x128xf32, #tpu.memory_space<vmem>>, vector<10x10x128xf32>
    tpu.vector_store %arg7[%c0_78, %c0_79, %c0_80], %72 {strides = array<i32>} : memref<10x10x128xf32, #tpu.memory_space<vmem>>, vector<10x10x128xf32>,
    %74 = vector.shape_cast %71 : vector<64x128xf32> to vector<8x8x128xf32>
    %c1_81 = arith.constant 1 : index
    %c1_82 = arith.constant 1 : index
    %c0_83 = arith.constant 0 : index
    %75 = vector.load %arg7[%c1_81, %c1_82, %c0_83] : memref<10x10x128xf32, #tpu.memory_space<vmem>>, vector<8x8x128xf32>
    tpu.vector_store %arg7[%c1_81, %c1_82, %c0_83], %74 {strides = array<i32>} : memref<10x10x128xf32, #tpu.memory_space<vmem>>, vector<8x8x128xf32>,
    %cst_84 = arith.constant 0.000000e+00 : f32
    %76 = vector.broadcast %cst_84 : f32 to vector<64x128xf32>
    %c0_85 = arith.constant 0 : index
    %c0_86 = arith.constant 0 : index
    %c0_87 = arith.constant 0 : index
    %77 = vector.load %arg7[%c0_85, %c0_86, %c0_87] : memref<10x10x128xf32, #tpu.memory_space<vmem>>, vector<8x8x128xf32>
    %78 = vector.shape_cast %77 : vector<8x8x128xf32> to vector<64x128xf32>
    %c0_88 = arith.constant 0 : index
    %c0_89 = arith.constant 0 : index
    %c0_90 = arith.constant 0 : index
    %79 = vector.load %arg3[%c0_88, %c0_89, %c0_90] : memref<9x128x128xf32, #tpu.memory_space<vmem>>, vector<1x128x128xf32>
    %80 = vector.shape_cast %79 : vector<1x128x128xf32> to vector<128x128xf32>
    %cst_91 = arith.constant dense<0.000000e+00> : vector<64x128xf32>
    %81 = tpu.matmul %78, %80, %cst_91 {dimension_numbers = #tpu.dot_dimension_numbers<[1], [0], [0], [1], [0, 0, 1, 1], [], []>} : vector<64x128xf32>, vector<128x128xf32>, vector<64x128xf32> -> vector<64x128xf32>
    %82 = arith.addf %76, %81 : vector<64x128xf32>
    %c0_92 = arith.constant 0 : index
    %c1_93 = arith.constant 1 : index
    %c0_94 = arith.constant 0 : index
    %83 = vector.load %arg7[%c0_92, %c1_93, %c0_94] : memref<10x10x128xf32, #tpu.memory_space<vmem>>, vector<8x8x128xf32>
    %84 = vector.shape_cast %83 : vector<8x8x128xf32> to vector<64x128xf32>
    %c1_95 = arith.constant 1 : index
    %c0_96 = arith.constant 0 : index
    %c0_97 = arith.constant 0 : index
    %85 = vector.load %arg3[%c1_95, %c0_96, %c0_97] : memref<9x128x128xf32, #tpu.memory_space<vmem>>, vector<1x128x128xf32>
    %86 = vector.shape_cast %85 : vector<1x128x128xf32> to vector<128x128xf32>
    %cst_98 = arith.constant dense<0.000000e+00> : vector<64x128xf32>
    %87 = tpu.matmul %84, %86, %cst_98 {dimension_numbers = #tpu.dot_dimension_numbers<[1], [0], [0], [1], [0, 0, 1, 1], [], []>} : vector<64x128xf32>, vector<128x128xf32>, vector<64x128xf32> -> vector<64x128xf32>
    %88 = arith.addf %82, %87 : vector<64x128xf32>
    %c0_99 = arith.constant 0 : index
    %c2_100 = arith.constant 2 : index
    %c0_101 = arith.constant 0 : index
    %89 = vector.load %arg7[%c0_99, %c2_100, %c0_101] : memref<10x10x128xf32, #tpu.memory_space<vmem>>, vector<8x8x128xf32>
    %90 = vector.shape_cast %89 : vector<8x8x128xf32> to vector<64x128xf32>
    %c2_102 = arith.constant 2 : index
    %c0_103 = arith.constant 0 : index
    %c0_104 = arith.constant 0 : index
    %91 = vector.load %arg3[%c2_102, %c0_103, %c0_104] : memref<9x128x128xf32, #tpu.memory_space<vmem>>, vector<1x128x128xf32>
    %92 = vector.shape_cast %91 : vector<1x128x128xf32> to vector<128x128xf32>
    %cst_105 = arith.constant dense<0.000000e+00> : vector<64x128xf32>
    %93 = tpu.matmul %90, %92, %cst_105 {dimension_numbers = #tpu.dot_dimension_numbers<[1], [0], [0], [1], [0, 0, 1, 1], [], []>} : vector<64x128xf32>, vector<128x128xf32>, vector<64x128xf32> -> vector<64x128xf32>
    %94 = arith.addf %88, %93 : vector<64x128xf32>
    %c1_106 = arith.constant 1 : index
    %c0_107 = arith.constant 0 : index
    %c0_108 = arith.constant 0 : index
    %95 = vector.load %arg7[%c1_106, %c0_107, %c0_108] : memref<10x10x128xf32, #tpu.memory_space<vmem>>, vector<8x8x128xf32>
    %96 = vector.shape_cast %95 : vector<8x8x128xf32> to vector<64x128xf32>
    %c3_109 = arith.constant 3 : index
    %c0_110 = arith.constant 0 : index
    %c0_111 = arith.constant 0 : index
    %97 = vector.load %arg3[%c3_109, %c0_110, %c0_111] : memref<9x128x128xf32, #tpu.memory_space<vmem>>, vector<1x128x128xf32>
    %98 = vector.shape_cast %97 : vector<1x128x128xf32> to vector<128x128xf32>
    %cst_112 = arith.constant dense<0.000000e+00> : vector<64x128xf32>
    %99 = tpu.matmul %96, %98, %cst_112 {dimension_numbers = #tpu.dot_dimension_numbers<[1], [0], [0], [1], [0, 0, 1, 1], [], []>} : vector<64x128xf32>, vector<128x128xf32>, vector<64x128xf32> -> vector<64x128xf32>
    %100 = arith.addf %94, %99 : vector<64x128xf32>
    %c1_113 = arith.constant 1 : index
    %c1_114 = arith.constant 1 : index
    %c0_115 = arith.constant 0 : index
    %101 = vector.load %arg7[%c1_113, %c1_114, %c0_115] : memref<10x10x128xf32, #tpu.memory_space<vmem>>, vector<8x8x128xf32>
    %102 = vector.shape_cast %101 : vector<8x8x128xf32> to vector<64x128xf32>
    %c4_116 = arith.constant 4 : index
    %c0_117 = arith.constant 0 : index
    %c0_118 = arith.constant 0 : index
    %103 = vector.load %arg3[%c4_116, %c0_117, %c0_118] : memref<9x128x128xf32, #tpu.memory_space<vmem>>, vector<1x128x128xf32>
    %104 = vector.shape_cast %103 : vector<1x128x128xf32> to vector<128x128xf32>
    %cst_119 = arith.constant dense<0.000000e+00> : vector<64x128xf32>
    %105 = tpu.matmul %102, %104, %cst_119 {dimension_numbers = #tpu.dot_dimension_numbers<[1], [0], [0], [1], [0, 0, 1, 1], [], []>} : vector<64x128xf32>, vector<128x128xf32>, vector<64x128xf32> -> vector<64x128xf32>
    %106 = arith.addf %100, %105 : vector<64x128xf32>
    %c1_120 = arith.constant 1 : index
    %c2_121 = arith.constant 2 : index
    %c0_122 = arith.constant 0 : index
    %107 = vector.load %arg7[%c1_120, %c2_121, %c0_122] : memref<10x10x128xf32, #tpu.memory_space<vmem>>, vector<8x8x128xf32>
    %108 = vector.shape_cast %107 : vector<8x8x128xf32> to vector<64x128xf32>
    %c5_123 = arith.constant 5 : index
    %c0_124 = arith.constant 0 : index
    %c0_125 = arith.constant 0 : index
    %109 = vector.load %arg3[%c5_123, %c0_124, %c0_125] : memref<9x128x128xf32, #tpu.memory_space<vmem>>, vector<1x128x128xf32>
    %110 = vector.shape_cast %109 : vector<1x128x128xf32> to vector<128x128xf32>
    %cst_126 = arith.constant dense<0.000000e+00> : vector<64x128xf32>
    %111 = tpu.matmul %108, %110, %cst_126 {dimension_numbers = #tpu.dot_dimension_numbers<[1], [0], [0], [1], [0, 0, 1, 1], [], []>} : vector<64x128xf32>, vector<128x128xf32>, vector<64x128xf32> -> vector<64x128xf32>
    %112 = arith.addf %106, %111 : vector<64x128xf32>
    %c2_127 = arith.constant 2 : index
    %c0_128 = arith.constant 0 : index
    %c0_129 = arith.constant 0 : index
    %113 = vector.load %arg7[%c2_127, %c0_128, %c0_129] : memref<10x10x128xf32, #tpu.memory_space<vmem>>, vector<8x8x128xf32>
    %114 = vector.shape_cast %113 : vector<8x8x128xf32> to vector<64x128xf32>
    %c6_130 = arith.constant 6 : index
    %c0_131 = arith.constant 0 : index
    %c0_132 = arith.constant 0 : index
    %115 = vector.load %arg3[%c6_130, %c0_131, %c0_132] : memref<9x128x128xf32, #tpu.memory_space<vmem>>, vector<1x128x128xf32>
    %116 = vector.shape_cast %115 : vector<1x128x128xf32> to vector<128x128xf32>
    %cst_133 = arith.constant dense<0.000000e+00> : vector<64x128xf32>
    %117 = tpu.matmul %114, %116, %cst_133 {dimension_numbers = #tpu.dot_dimension_numbers<[1], [0], [0], [1], [0, 0, 1, 1], [], []>} : vector<64x128xf32>, vector<128x128xf32>, vector<64x128xf32> -> vector<64x128xf32>
    %118 = arith.addf %112, %117 : vector<64x128xf32>
    %c2_134 = arith.constant 2 : index
    %c1_135 = arith.constant 1 : index
    %c0_136 = arith.constant 0 : index
    %119 = vector.load %arg7[%c2_134, %c1_135, %c0_136] : memref<10x10x128xf32, #tpu.memory_space<vmem>>, vector<8x8x128xf32>
    %120 = vector.shape_cast %119 : vector<8x8x128xf32> to vector<64x128xf32>
    %c7_137 = arith.constant 7 : index
    %c0_138 = arith.constant 0 : index
    %c0_139 = arith.constant 0 : index
    %121 = vector.load %arg3[%c7_137, %c0_138, %c0_139] : memref<9x128x128xf32, #tpu.memory_space<vmem>>, vector<1x128x128xf32>
    %122 = vector.shape_cast %121 : vector<1x128x128xf32> to vector<128x128xf32>
    %cst_140 = arith.constant dense<0.000000e+00> : vector<64x128xf32>
    %123 = tpu.matmul %120, %122, %cst_140 {dimension_numbers = #tpu.dot_dimension_numbers<[1], [0], [0], [1], [0, 0, 1, 1], [], []>} : vector<64x128xf32>, vector<128x128xf32>, vector<64x128xf32> -> vector<64x128xf32>
    %124 = arith.addf %118, %123 : vector<64x128xf32>
    %c2_141 = arith.constant 2 : index
    %c2_142 = arith.constant 2 : index
    %c0_143 = arith.constant 0 : index
    %125 = vector.load %arg7[%c2_141, %c2_142, %c0_143] : memref<10x10x128xf32, #tpu.memory_space<vmem>>, vector<8x8x128xf32>
    %126 = vector.shape_cast %125 : vector<8x8x128xf32> to vector<64x128xf32>
    %c8_144 = arith.constant 8 : index
    %c0_145 = arith.constant 0 : index
    %c0_146 = arith.constant 0 : index
    %127 = vector.load %arg3[%c8_144, %c0_145, %c0_146] : memref<9x128x128xf32, #tpu.memory_space<vmem>>, vector<1x128x128xf32>
    %128 = vector.shape_cast %127 : vector<1x128x128xf32> to vector<128x128xf32>
    %cst_147 = arith.constant dense<0.000000e+00> : vector<64x128xf32>
    %129 = tpu.matmul %126, %128, %cst_147 {dimension_numbers = #tpu.dot_dimension_numbers<[1], [0], [0], [1], [0, 0, 1, 1], [], []>} : vector<64x128xf32>, vector<128x128xf32>, vector<64x128xf32> -> vector<64x128xf32>
    %130 = arith.addf %124, %129 : vector<64x128xf32>
    %c2_148 = arith.constant 2 : index
    %c0_149 = arith.constant 0 : index
    %131 = vector.load %arg5[%c2_148, %c0_149] : memref<6x128xf32, #tpu.memory_space<vmem>>, vector<1x128xf32>
    %132 = vector.broadcast %131 : vector<1x128xf32> to vector<64x128xf32>
    %133 = arith.mulf %130, %132 : vector<64x128xf32>
    %c3_150 = arith.constant 3 : index
    %c0_151 = arith.constant 0 : index
    %134 = vector.load %arg5[%c3_150, %c0_151] : memref<6x128xf32, #tpu.memory_space<vmem>>, vector<1x128xf32>
    %135 = vector.broadcast %134 : vector<1x128xf32> to vector<64x128xf32>
    %136 = arith.addf %133, %135 : vector<64x128xf32>
    %c0_152 = arith.constant 0 : index
    %c3_153 = arith.constant 3 : index
    %c0_154 = arith.constant 0 : index
    %c0_155 = arith.constant 0 : index
    %c0_156 = arith.constant 0 : index
    %137 = vector.load %arg1[%c0_152, %c3_153, %c0_154, %c0_155, %c0_156] : memref<1x4x9x9x4xf32, #tpu.memory_space<vmem>>, vector<1x1x8x8x4xf32>
    %138 = vector.shape_cast %137 : vector<1x1x8x8x4xf32> to vector<8x8x4xf32>
    %139 = vector.shape_cast %138 : vector<8x8x4xf32> to vector<64x4xf32>
    %c0_157 = arith.constant 0 : index
    %c0_158 = arith.constant 0 : index
    %140 = vector.load %arg4[%c0_157, %c0_158] : memref<4x128xf32, #tpu.memory_space<vmem>>, vector<4x128xf32>
    %cst_159 = arith.constant dense<0.000000e+00> : vector<64x128xf32>
    %141 = tpu.matmul %139, %140, %cst_159 {dimension_numbers = #tpu.dot_dimension_numbers<[1], [0], [0], [1], [0, 0, 1, 1], [], []>} : vector<64x4xf32>, vector<4x128xf32>, vector<64x128xf32> -> vector<64x128xf32>
    %c4_160 = arith.constant 4 : index
    %c0_161 = arith.constant 0 : index
    %142 = vector.load %arg5[%c4_160, %c0_161] : memref<6x128xf32, #tpu.memory_space<vmem>>, vector<1x128xf32>
    %143 = vector.broadcast %142 : vector<1x128xf32> to vector<64x128xf32>
    %144 = arith.mulf %141, %143 : vector<64x128xf32>
    %145 = arith.addf %136, %144 : vector<64x128xf32>
    %c5_162 = arith.constant 5 : index
    %c0_163 = arith.constant 0 : index
    %146 = vector.load %arg5[%c5_162, %c0_163] : memref<6x128xf32, #tpu.memory_space<vmem>>, vector<1x128xf32>
    %147 = vector.broadcast %146 : vector<1x128xf32> to vector<64x128xf32>
    %148 = arith.addf %145, %147 : vector<64x128xf32>
    %cst_164 = arith.constant 0.000000e+00 : f32
    %149 = vector.broadcast %cst_164 : f32 to vector<64x128xf32>
    %150 = arith.maximumf %148, %149 : vector<64x128xf32>
    %151 = vector.shape_cast %150 : vector<64x128xf32> to vector<8x8x128xf32>
    %c0_165 = arith.constant 0 : index
    %c0_166 = arith.constant 0 : index
    %c0_167 = arith.constant 0 : index
    %c0_168 = arith.constant 0 : index
    %152 = vector.load %arg6[%c0_165, %c0_166, %c0_167, %c0_168] : memref<1x8x8x128xf32, #tpu.memory_space<vmem>>, vector<1x8x8x128xf32>
    %153 = vector.shape_cast %152 : vector<1x8x8x128xf32> to vector<8x8x128xf32>
    %154 = vector.shape_cast %151 : vector<8x8x128xf32> to vector<1x8x8x128xf32>
    tpu.vector_store %arg6[%c0_165, %c0_166, %c0_167, %c0_168], %154 {strides = array<i32>} : memref<1x8x8x128xf32, #tpu.memory_space<vmem>>, vector<1x8x8x128xf32>,
    return
  }
  func.func @transform_0(%arg0: i32) -> (i32, i32, i32, i32, i32) {
    %c0_i32 = arith.constant 0 : i32
    %c0_i32_0 = arith.constant 0 : i32
    %c0_i32_1 = arith.constant 0 : i32
    %c0_i32_2 = arith.constant 0 : i32
    %c0_i32_3 = arith.constant 0 : i32
    return %arg0, %c0_i32, %c0_i32_0, %c0_i32_1, %c0_i32_2 : i32, i32, i32, i32, i32
  }
  func.func @transform_1(%arg0: i32) -> (i32, i32, i32) {
    %c0_i32 = arith.constant 0 : i32
    %c0_i32_0 = arith.constant 0 : i32
    %c0_i32_1 = arith.constant 0 : i32
    %c0_i32_2 = arith.constant 0 : i32
    return %c0_i32, %c0_i32_0, %c0_i32_1 : i32, i32, i32
  }
  func.func @transform_2(%arg0: i32) -> (i32, i32, i32) {
    %c0_i32 = arith.constant 0 : i32
    %c0_i32_0 = arith.constant 0 : i32
    %c0_i32_1 = arith.constant 0 : i32
    %c0_i32_2 = arith.constant 0 : i32
    return %c0_i32, %c0_i32_0, %c0_i32_1 : i32, i32, i32
  }
  func.func @transform_3(%arg0: i32) -> (i32, i32) {
    %c0_i32 = arith.constant 0 : i32
    %c0_i32_0 = arith.constant 0 : i32
    %c0_i32_1 = arith.constant 0 : i32
    return %c0_i32, %c0_i32_0 : i32, i32
  }
  func.func @transform_4(%arg0: i32) -> (i32, i32) {
    %c0_i32 = arith.constant 0 : i32
    %c0_i32_0 = arith.constant 0 : i32
    %c0_i32_1 = arith.constant 0 : i32
    return %c0_i32, %c0_i32_0 : i32, i32
  }
  func.func @transform_5(%arg0: i32) -> (i32, i32, i32, i32) {
    %c0_i32 = arith.constant 0 : i32
    %c0_i32_0 = arith.constant 0 : i32
    %c0_i32_1 = arith.constant 0 : i32
    %c0_i32_2 = arith.constant 0 : i32
    return %arg0, %c0_i32, %c0_i32_0, %c0_i32_1 : i32, i32, i32, i32
  }
}

</mosaic_0001>

<bundles_post_ra>
// kernel: basic_block_forward.1
= control target key start
LH: loop header
LB: loop body
LE: loop exit
PB: predicated region body
PF: predicated region fallthrough
CT: control target
= control target key end

     0   :  { %s4740_s18 = smov 0   ;;  %s5640_s0 = inlined_call_operand.vmem [shape: f32[2,4,9,9,4], index: 0, kind: input, shape index: {}]   ;;  %s5641_s1 = inlined_call_operand.vmem [shape: f32[9,4,128], index: 1, kind: input, shape index: {}]   ;;  %s5642_s2 = inlined_call_operand.vmem [shape: f32[9,128,128], index: 2, kind: input, shape index: {}]   ;;  %s5643_s3 = inlined_call_operand.vmem [shape: f32[4,128], index: 3, kind: input, shape index: {}]   ;;  %s5644_s4 = inlined_call_operand.vmem [shape: f32[6,128], index: 4, kind: input, shape index: {}]   ;;  %s5645_s5 = inlined_call_operand.vmem [shape: f32[2,8,8,128], index: 5, kind: output, shape index: {}]  }
   0x1 LB: > { %s3126_s19 = sadd.s32 4294967295, %s4707_s18   ;;  %p3130_p0 = scmp.ge.s32.totalorder %s4707_s18, 1  ;;  %s4707_s18 = sphi %s4740_s18, %s15_s18  }
   0x2   : > { %p187_p1 = scmp.lt.s32.totalorder %s4707_s18, 3 }
   0x4   : > { %p188_p2 = pnand %p3130_p0, %p187_p1 }
   0x5   : > { %v3142_v0 = vld [vmem:[%s5641_s1 + $0x4] sm:$0xf] (!%p188_p2)  ;;  %vm270_vm0 = vcmask (!%p188_p2), 1043456   ;;  %p215_p3 = scmp.lt.s32.totalorder (!%p188_p2), %s3126_s19, 1  ;;  %v233_v1 = vld [vmem:[%s5641_s1] sm:$0xf] (!%p188_p2) }
   0x6   : > { %191 = sbr.rel (%p188_p2) target bundleno = 804 (0x324), region = 40  ;;  %3739 = vmatprep.subr.msk.mxu0 (!%p188_p2), %vm270_vm0, %v3142_v0  ;;  %vm245_vm1 = vcmask (!%p188_p2), 31744   ;;  %v3161_v5 = vld [vmem:[%s5641_s1 + $0x8] sm:$0xf] (!%p188_p2)  ;;  %v3179_v14 = vld [vmem:[%s5641_s1 + $0xc] sm:$0xf] (!%p188_p2) }
   0x7   : > { %3740 = vmatpush3.msk.msra.mxu0 (!%p188_p2), %vm270_vm0, %v3142_v0  ;;  %v3297_v15 = vld [vmem:[%s5642_s2 + $0x100] sm:$0xff] (!%p188_p2)  ;;  %v3298_v16 = vld [vmem:[%s5642_s2 + $0x108] sm:$0xff] (!%p188_p2)  ;;  %v3299_v19 = vld [vmem:[%s5642_s2 + $0x110] sm:$0xff] (!%p188_p2) }
   0x8   : > { %3753 = vmatprep.subr.msk.mxu0 (!%p188_p2), %vm270_vm0, %v233_v1  ;;  %v4339_v18 = vpack.c.bf16 (!%p188_p2), %v3298_v16, %v3297_v15  ;;  %v3300_v20 = vld [vmem:[%s5642_s2 + $0x118] sm:$0xff] (!%p188_p2)  ;;  %v3301_v23 = vld [vmem:[%s5642_s2 + $0x120] sm:$0xff] (!%p188_p2)  ;;  %v3302_v24 = vld [vmem:[%s5642_s2 + $0x128] sm:$0xff] (!%p188_p2) }
   0x9   : > { %v4343_v22 = vpack.c.bf16 (!%p188_p2), %v3300_v20, %v3299_v19  ;;  %v4347_v26 = vpack.c.bf16 (!%p188_p2), %v3302_v24, %v3301_v23  ;;  %v3303_v28 = vld [vmem:[%s5642_s2 + $0x130] sm:$0xff] (!%p188_p2)  ;;  %v3304_v29 = vld [vmem:[%s5642_s2 + $0x138] sm:$0xff] (!%p188_p2)  ;;  %v3305_v33 = vld [vmem:[%s5642_s2 + $0x140] sm:$0xff] (!%p188_p2) }
   0xa   : > { %4340 = vmatprep.subr.bf16.mxu1 (!%p188_p2), %v4339_v18  ;;  %v4351_v31 = vpack.c.bf16 (!%p188_p2), %v3304_v29, %v3303_v28  ;;  %v3306_v34 = vld [vmem:[%s5642_s2 + $0x148] sm:$0xff] (!%p188_p2)  ;;  %v3197_v38 = vld [vmem:[%s5641_s1 + $0x10] sm:$0xf] (!%p188_p2)  ;;  %v3215_v47 = vld [vmem:[%s5641_s1 + $0x14] sm:$0xf] (!%p188_p2) }
   0xb   : > { %4342 = vmatpush3.bf16.msra.mxu1 (!%p188_p2), %v4339_v18  ;;  %v4355_v37 = vpack.c.bf16 (!%p188_p2), %v3306_v34, %v3305_v33  ;;  %v3233_v56 = vld [vmem:[%s5641_s1 + $0x18] sm:$0xf] (!%p188_p2)  ;;  %v3269_v16 = vld [vmem:[%s5641_s1 + $0x20] sm:$0xf] (!%p188_p2)  ;;  %v3287_v19 = vld [vmem:[%s5642_s2 + $0xb0] sm:$0xff] (!%p188_p2) }
   0xc   : > { %4344 = vmatprep.subr.bf16.mxu1 (!%p188_p2), %v4343_v22  ;;  %v3288_v20 = vld [vmem:[%s5642_s2 + $0xb8] sm:$0xff] (!%p188_p2)  ;;  %v3290_v23 = vld [vmem:[%s5642_s2 + $0xc8] sm:$0xff] (!%p188_p2)  ;;  %v3293_v29 = vld [vmem:[%s5642_s2 + $0xe0] sm:$0xff] (!%p188_p2) }
   0xd   : > { %s5647_s19 = smov (!%p215_p3, %s3126_s19), 1  ;;  %v3307_v33 = vld [vmem:[%s5642_s2 + $0x150] sm:$0xff]  ;;  %v3308_v34 = vld [vmem:[%s5642_s2 + $0x158] sm:$0xff] }
   0xe   : > { %s4691_s24 = smul.u32 576, %s5647_s19  ;;  %s3432_s6 = sshll.u32 %s5647_s19, 6 }
   0xf   : > { %4346 = vmatpush3.bf16.msra.mxu1 %v4343_v22  ;;  %v3289_v22 = vld [vmem:[%s5642_s2 + $0xc0] sm:$0xff]  ;;  %s5627_s9 = scalar_lea.vmem %s5645_s5, %s3432_s6 }
  0x10   : > { %s4763_s27 = scalar_lea.vmem %s5640_s0, %s4691_s24  ;;  %4348 = vmatprep.subr.bf16.mxu1 %v4347_v26 }
  0x11   : > { %v3134_v2 = vld [vmem:[%s4763_s27 + $0x90] sm:$0xff]  ;;  %v4767_v3 = vld [vmem:[%s4763_s27 + $0xa0] sm:$0xff] }
  0x12   : > { %v4770_v4 = vld [vmem:[%s4763_s27 + $0xb0] sm:$0xff]  ;;  %3741 = vmatprep.mubr.msk.f32.mxu0 %vm245_vm1, %v3134_v2  ;;  %v4782_v6 = vld [vmem:[%s4763_s27 + $0xc0] sm:$0xff] }
  0x13   : > { %3742 = vmatmul.mubr.msk.f32.vlgmr.msra.gmra.mrb[0].mxu0 %vm245_vm1, %v4767_v3  ;;  %v4785_v7 = vld [vmem:[%s4763_s27 + $0xd0] sm:$0xff]  ;;  %v4793_v8 = vld [vmem:[%s4763_s27 + $0xe0] sm:$0xff]  ;;  %4350 = vmatpush3.bf16.msra.mxu1 %v4347_v26 }
  0x14   : > { %3754 = vmatpush3.msk.msra.mxu0 %vm270_vm0, %v233_v1  ;;  %3744 = vmatprep.mubr.msk.f32.mxu0 %vm245_vm1, %v4770_v4  ;;  %v4796_v9 = vld [vmem:[%s4763_s27 + $0xf0] sm:$0xff]  ;;  %v4803_v10 = vld [vmem:[%s4763_s27 + $0x100] sm:$0xff]  ;;  %v3251_v1 = vld [vmem:[%s5641_s1 + $0x1c] sm:$0xf] }
  0x15   : > { %3767 = vmatprep.subr.msk.mxu0 %vm270_vm0, %v3161_v5  ;;  %v225_v11 = vld [vmem:[%s4763_s27] sm:$0xff]  ;;  %v4810_v12 = vld [vmem:[%s4763_s27 + $0x10] sm:$0xff]  ;;  %4352 = vmatprep.subr.bf16.mxu1 %v4351_v31 }
  0x16   : > { %v4813_v13 = vld [vmem:[%s4763_s27 + $0x20] sm:$0xff]  ;;  %v4830_v17 = vld [vmem:[%s4763_s27 + $0x30] sm:$0xff] }
  0x17   : > { %3745 = vmatmul.mubr.msk.f32.gmra.mrb[2].mxu0 %vm245_vm1, %v4782_v6  ;;  %v4839_v21 = vld [vmem:[%s4763_s27 + $0x40] sm:$0xff]  ;;  %v4853_v25 = vld [vmem:[%s4763_s27 + $0x50] sm:$0xff]  ;;  %4354 = vmatpush3.bf16.msra.mxu1 %v4351_v31 }
  0x18   : > { %3747 = vmatprep.mubr.msk.f32.mxu0 %vm245_vm1, %v4785_v7  ;;  %v4856_v27 = vld [vmem:[%s4763_s27 + $0x60] sm:$0xff]  ;;  %v4869_v30 = vld [vmem:[%s4763_s27 + $0x70] sm:$0xff]  ;;  %4356 = vmatprep.subr.bf16.mxu1 %v4355_v37 }
  0x19   : > { %v511_v32 = vld [vmem:[%s4763_s27 + $0x1] sm:$0xff]  ;;  %v4882_v35 = vld [vmem:[%s4763_s27 + $0x11] sm:$0xff] }
  0x1a   : > { %v4885_v36 = vld [vmem:[%s4763_s27 + $0x21] sm:$0xff]  ;;  %v4896_v39 = vld [vmem:[%s4763_s27 + $0x31] sm:$0xff] }
  0x1b   : > { %3748 = vmatmul.mubr.msk.f32.gmra.mrb[4].mxu0 %vm245_vm1, %v4793_v8  ;;  %v4899_v40 = vld [vmem:[%s4763_s27 + $0x41] sm:$0xff]  ;;  %4358 = vmatpush3.bf16.msra.mxu1 %v4355_v37  ;;  %v4907_v41 = vld [vmem:[%s4763_s27 + $0x51] sm:$0xff] }
  0x1c   : > { %3750 = vmatprep.mubr.msk.f32.mxu0 %vm245_vm1, %v4796_v9  ;;  %v4910_v42 = vld [vmem:[%s4763_s27 + $0x61] sm:$0xff]  ;;  %v4917_v43 = vld [vmem:[%s4763_s27 + $0x71] sm:$0xff] }
  0x1d   : > { %v3171_v44 = vld [vmem:[%s4763_s27 + $0x120] sm:$0xff]  ;;  %v3172_v45 = vld [vmem:[%s4763_s27 + $0x130] sm:$0xff]  ;;  %v3296_v37 = vld [vmem:[%s5642_s2 + $0xf8] sm:$0xff] }
  0x1e   : > { %v3173_v46 = vld [vmem:[%s4763_s27 + $0x140] sm:$0xff]  ;;  %v3174_v48 = vld [vmem:[%s4763_s27 + $0x150] sm:$0xff] }
  0x1f   : > { %3751 = vmatmul.mubr.msk.f32.gmra.mrb[6].mxu0 %vm245_vm1, %v4803_v10  ;;  %v3175_v49 = vld [vmem:[%s4763_s27 + $0x160] sm:$0xff]  ;;  %v3176_v50 = vld [vmem:[%s4763_s27 + $0x170] sm:$0xff] }
  0x20   : > { %3755 = vmatprep.mubr.msk.f32.mxu0 %vm245_vm1, %v225_v11  ;;  %v3177_v51 = vld [vmem:[%s4763_s27 + $0x180] sm:$0xff]  ;;  %v3178_v52 = vld [vmem:[%s4763_s27 + $0x190] sm:$0xff] }
  0x21   : > { %v3189_v53 = vld [vmem:[%s4763_s27 + $0x1b0] sm:$0xff]  ;;  %v3190_v54 = vld [vmem:[%s4763_s27 + $0x1c0] sm:$0xff] }
  0x22   : > { %v3191_v55 = vld [vmem:[%s4763_s27 + $0x1d0] sm:$0xff]  ;;  %v3192_v57 = vld [vmem:[%s4763_s27 + $0x1e0] sm:$0xff] }
  0x23   : > { %3756 = vmatmul.mubr.msk.f32.vlgmr.msra.gmra.mrb[0].mxu0 %vm245_vm1, %v4810_v12  ;;  %v3193_v58 = vld [vmem:[%s4763_s27 + $0x1f0] sm:$0xff]  ;;  %v3194_v59 = vld [vmem:[%s4763_s27 + $0x200] sm:$0xff] }
  0x24   : > { %3768 = vmatpush3.msk.msra.mxu0 %vm270_vm0, %v3161_v5  ;;  %3758 = vmatprep.mubr.msk.f32.mxu0 %vm245_vm1, %v4813_v13  ;;  %v3195_v60 = vld [vmem:[%s4763_s27 + $0x210] sm:$0xff]  ;;  %v3196_v61 = vld [vmem:[%s4763_s27 + $0x220] sm:$0xff] }
  0x25   : > { %3781 = vmatprep.subr.msk.mxu0 %vm270_vm0, %v3179_v14  ;;  %v3207_v62 = vld [vmem:[%s4763_s27 + $0x121] sm:$0xff]  ;;  %v3208_v63 = vld [vmem:[%s4763_s27 + $0x131] sm:$0xff] }
  0x26   : > { %v3209_v0 = vld [vmem:[%s4763_s27 + $0x141] sm:$0xff]  ;;  %v3210_v2 = vld [vmem:[%s4763_s27 + $0x151] sm:$0xff] }
  0x27   : > { %3759 = vmatmul.mubr.msk.f32.gmra.mrb[2].mxu0 %vm245_vm1, %v4830_v17  ;;  %v3211_v5 = vld [vmem:[%s4763_s27 + $0x161] sm:$0xff]  ;;  %v3212_v11 = vld [vmem:[%s4763_s27 + $0x171] sm:$0xff] }
  0x28   : > { %3761 = vmatprep.mubr.msk.f32.mxu0 %vm245_vm1, %v4839_v21  ;;  %v3214_v15 = vld [vmem:[%s4763_s27 + $0x191] sm:$0xff]  ;;  %v3268_v24 = vld [vmem:[%s4763_s27 + $0x81] sm:$0xff] }
  0x29   : > { %v3291_v26 = vld [vmem:[%s5642_s2 + $0xd0] sm:$0xff] }
  0x2b   : > { %3762 = vmatmul.mubr.msk.f32.gmra.mrb[4].mxu0 %vm245_vm1, %v4853_v25 }
  0x2c   : > { %3764 = vmatprep.mubr.msk.f32.mxu0 %vm245_vm1, %v4856_v27 }
  0x2f   : > { %3765 = vmatmul.mubr.msk.f32.gmra.mrb[6].mxu0 %vm245_vm1, %v4869_v30 }
  0x30   : > { %3769 = vmatprep.mubr.msk.f32.mxu0 %vm245_vm1, %v511_v32  ;;  %v4709_v32 = vmov 0.0  }
  0x31   : > { %1603 = vst [vmem:[#allocation2 + $0x20] sm:$0xff] %v4709_v32  ;;  %1604 = vst [vmem:[#allocation2 + $0x28] sm:$0x3] %v4709_v32 }
  0x32   : > { %1599 = vst [vmem:[#allocation2] sm:$0xff] %v4709_v32  ;;  %1600 = vst [vmem:[#allocation2 + $0x8] sm:$0x3] %v4709_v32 }
  0x33   : > { %3770 = vmatmul.mubr.msk.f32.vlgmr.msra.gmra.mrb[0].mxu0 %vm245_vm1, %v4882_v35  ;;  %1601 = vst [vmem:[#allocation2 + $0x10] sm:$0xff] %v4709_v32  ;;  %1602 = vst [vmem:[#allocation2 + $0x18] sm:$0x3] %v4709_v32 }
  0x34   : > { %3782 = vmatpush3.msk.msra.mxu0 %vm270_vm0, %v3179_v14  ;;  %3772 = vmatprep.mubr.msk.f32.mxu0 %vm245_vm1, %v4885_v36  ;;  %v3213_v14 = vld [vmem:[%s4763_s27 + $0x181] sm:$0xff]  ;;  %1605 = vst [vmem:[#allocation2 + $0x30] sm:$0xff] %v4709_v32  ;;  %1606 = vst [vmem:[#allocation2 + $0x38] sm:$0x3] %v4709_v32 }
  0x35   : > { %3795 = vmatprep.subr.msk.mxu0 %vm270_vm0, %v3197_v38  ;;  %1607 = vst [vmem:[#allocation2 + $0x40] sm:$0xff] %v4709_v32  ;;  %1608 = vst [vmem:[#allocation2 + $0x48] sm:$0x3] %v4709_v32 }
  0x36   : > { %1609 = vst [vmem:[#allocation2 + $0x50] sm:$0xff] %v4709_v32  ;;  %1610 = vst [vmem:[#allocation2 + $0x58] sm:$0x3] %v4709_v32 }
  0x37   : > { %3773 = vmatmul.mubr.msk.f32.gmra.mrb[2].mxu0 %vm245_vm1, %v4896_v39  ;;  %1611 = vst [vmem:[#allocation2 + $0x60] sm:$0xff] %v4709_v32  ;;  %1612 = vst [vmem:[#allocation2 + $0x68] sm:$0x3] %v4709_v32 }
  0x38   : > { %3775 = vmatprep.mubr.msk.f32.mxu0 %vm245_vm1, %v4899_v40  ;;  %1613 = vst [vmem:[#allocation2 + $0x70] sm:$0xff] %v4709_v32  ;;  %1614 = vst [vmem:[#allocation2 + $0x78] sm:$0x3] %v4709_v32 }
  0x39   : > { %1615 = vst [vmem:[#allocation2 + $0x80] sm:$0xff] %v4709_v32  ;;  %1616 = vst [vmem:[#allocation2 + $0x88] sm:$0x3] %v4709_v32 }
  0x3a   : > { %1617 = vst [vmem:[#allocation2 + $0x90] sm:$0xff] %v4709_v32  ;;  %1618 = vst [vmem:[#allocation2 + $0x98] sm:$0x3] %v4709_v32 }
  0x3b   : > { %3776 = vmatmul.mubr.msk.f32.gmra.mrb[4].mxu0 %vm245_vm1, %v4907_v41 }
  0x3c   : > { %3778 = vmatprep.mubr.msk.f32.mxu0 %vm245_vm1, %v4910_v42 }
  0x3f   : > { %3779 = vmatmul.mubr.msk.f32.gmra.mrb[6].mxu0 %vm245_vm1, %v4917_v43 }
  0x40   : > { %3783 = vmatprep.mubr.msk.f32.mxu0 %vm245_vm1, %v3171_v44  ;;  %v1652_v44 = vld [vmem:[#allocation2 + $0x1] sm:$0xff] }
  0x43   : > { %3784 = vmatmul.mubr.msk.f32.vlgmr.msra.gmra.mrb[0].mxu0 %vm245_vm1, %v3172_v45 }
  0x44   : > { %3796 = vmatpush3.msk.msra.mxu0 %vm270_vm0, %v3197_v38  ;;  %3786 = vmatprep.mubr.msk.f32.mxu0 %vm245_vm1, %v3173_v46  ;;  %v3311_v46 = vld [vmem:[%s5642_s2 + $0x170] sm:$0xff] }
  0x45   : > { %3809 = vmatprep.subr.msk.mxu0 %vm270_vm0, %v3215_v47 }
  0x47   : > { %3787 = vmatmul.mubr.msk.f32.gmra.mrb[2].mxu0 %vm245_vm1, %v3174_v48 }
  0x48   : > { %3789 = vmatprep.mubr.msk.f32.mxu0 %vm245_vm1, %v3175_v49  ;;  %v3313_v49 = vld [vmem:[%s5642_s2 + $0x180] sm:$0xff] }
  0x4b   : > { %3790 = vmatmul.mubr.msk.f32.gmra.mrb[4].mxu0 %vm245_vm1, %v3176_v50  ;;  %v3314_v50 = vld [vmem:[%s5642_s2 + $0x188] sm:$0xff] }
  0x4c   : > { %3792 = vmatprep.mubr.msk.f32.mxu0 %vm245_vm1, %v3177_v51  ;;  %v5136_v51 = vpack.c.bf16 %v3314_v50, %v3313_v49  ;;  %v1647_v49 = vld [vmem:[%s5642_s2 + $0x58] sm:$0xff] }
  0x4f   : > { %3793 = vmatmul.mubr.msk.f32.gmra.mrb[6].mxu0 %vm245_vm1, %v3178_v52  ;;  %v1887_v52 = vld [vmem:[#allocation2 + $0x2] sm:$0xff] }
  0x50   : > { %3797 = vmatprep.mubr.msk.f32.mxu0 %vm245_vm1, %v3189_v53  ;;  %3985 = vmatprep.mubr.f32.mxu1 %v1887_v52  ;;  %v3279_v53 = vld [vmem:[%s5644_s4] ss:$0 sm:$0xff] }
  0x51   : > { %v3321_v52 = vld [vmem:[%s5642_s2 + $0x1c0] sm:$0xff] }
  0x53   : > { %3798 = vmatmul.mubr.msk.f32.vlgmr.msra.gmra.mrb[0].mxu0 %vm245_vm1, %v3190_v54 }
  0x54   : > { %3810 = vmatpush3.msk.msra.mxu0 %vm270_vm0, %v3215_v47  ;;  %3800 = vmatprep.mubr.msk.f32.mxu0 %vm245_vm1, %v3191_v55  ;;  %v3312_v47 = vld [vmem:[%s5642_s2 + $0x178] sm:$0xff]  ;;  %v3280_v55 = vld [vmem:[%s5644_s4 + $0x1] ss:$0 sm:$0xff] }
  0x55   : > { %3823 = vmatprep.subr.msk.mxu0 %vm270_vm0, %v3233_v56  ;;  %v4367_v48 = vpack.c.bf16 %v3312_v47, %v3311_v46 }
  0x57   : > { %3801 = vmatmul.mubr.msk.f32.gmra.mrb[2].mxu0 %vm245_vm1, %v3192_v57 }
  0x58   : > { %3803 = vmatprep.mubr.msk.f32.mxu0 %vm245_vm1, %v3193_v58 }
  0x5b   : > { %3804 = vmatmul.mubr.msk.f32.gmra.mrb[4].mxu0 %vm245_vm1, %v3194_v59 }
  0x5c   : > { %3806 = vmatprep.mubr.msk.f32.mxu0 %vm245_vm1, %v3195_v60  ;;  %v1638_v60 = vld [vmem:[%s5642_s2 + $0x10] sm:$0xff] }
  0x5f   : > { %3807 = vmatmul.mubr.msk.f32.gmra.mrb[6].mxu0 %vm245_vm1, %v3196_v61  ;;  %v1639_v61 = vld [vmem:[%s5642_s2 + $0x18] sm:$0xff] }
  0x60   : > { %3811 = vmatprep.mubr.msk.f32.mxu0 %vm245_vm1, %v3207_v62 }
  0x63   : > { %3812 = vmatmul.mubr.msk.f32.vlgmr.msra.gmra.mrb[0].mxu0 %vm245_vm1, %v3208_v63 }
  0x64   : > { %3824 = vmatpush3.msk.msra.mxu0 %vm270_vm0, %v3233_v56  ;;  %3814 = vmatprep.mubr.msk.f32.mxu0 %vm245_vm1, %v3209_v0 }
  0x65   : > { %3837 = vmatprep.subr.msk.mxu0 %vm270_vm0, %v3251_v1 }
  0x67   : > { %3815 = vmatmul.mubr.msk.f32.gmra.mrb[2].mxu0 %vm245_vm1, %v3210_v2 }
  0x68   : > { %3817 = vmatprep.mubr.msk.f32.mxu0 %vm245_vm1, %v3211_v5 }
  0x6b   : > { %3818 = vmatmul.mubr.msk.f32.gmra.mrb[4].mxu0 %vm245_vm1, %v3212_v11 }
  0x6c   : > { %3820 = vmatprep.mubr.msk.f32.mxu0 %vm245_vm1, %v3213_v14  ;;  %v4311_v14 = vpack.c.bf16 %v1639_v61, %v1638_v60  ;;  %v3323_v60 = vld [vmem:[%s5642_s2 + $0x1d0] sm:$0xff]  ;;  %v3324_v61 = vld [vmem:[%s5642_s2 + $0x1d8] sm:$0xff] }
  0x6f   : > { %3821 = vmatmul.mubr.msk.f32.gmra.mrb[6].mxu0 %vm245_vm1, %v3214_v15 }
  0x70   : > { %3825 = vmatprep.mubr.msk.f32.mxu0 %vm245_vm1, %v4810_v12  ;;  %v3232_v12 = vld [vmem:[%s4763_s27 + $0x80] sm:$0xff] }
  0x73   : > { %3826 = vmatmul.mubr.msk.f32.vlgmr.msra.gmra.mrb[0].mxu0 %vm245_vm1, %v4813_v13  ;;  %v3281_v13 = vld [vmem:[%s5642_s2 + $0x80] sm:$0xff] }
  0x74   : > { %3838 = vmatpush3.msk.msra.mxu0 %vm270_vm0, %v3251_v1  ;;  %3828 = vmatprep.mubr.msk.f32.mxu0 %vm245_vm1, %v4830_v17  ;;  %v3282_v17 = vld [vmem:[%s5642_s2 + $0x88] sm:$0xff] }
  0x75   : > { %3851 = vmatprep.subr.msk.mxu0 %vm270_vm0, %v3269_v16  ;;  %v4275_v18 = vpack.c.bf16 %v3282_v17, %v3281_v13 }
  0x77   : > { %3829 = vmatmul.mubr.msk.f32.gmra.mrb[2].mxu0 %vm245_vm1, %v4839_v21  ;;  %v4287_v21 = vpack.c.bf16 %v3288_v20, %v3287_v19  ;;  %v3316_v19 = vld [vmem:[%s5642_s2 + $0x198] sm:$0xff] }
  0x78   : > { %3831 = vmatprep.mubr.msk.f32.mxu0 %vm245_vm1, %v4853_v25  ;;  %v4291_v25 = vpack.c.bf16 %v3290_v23, %v3289_v22  ;;  %v1642_v22 = vld [vmem:[%s5642_s2 + $0x30] sm:$0xff]  ;;  %v1643_v23 = vld [vmem:[%s5642_s2 + $0x38] sm:$0xff] }
  0x7b   : > { %3832 = vmatmul.mubr.msk.f32.gmra.mrb[4].mxu0 %vm245_vm1, %v4856_v27  ;;  %v3292_v27 = vld [vmem:[%s5642_s2 + $0xd8] sm:$0xff] }
  0x7c   : > { %3834 = vmatprep.mubr.msk.f32.mxu0 %vm245_vm1, %v4869_v30  ;;  %v4295_v28 = vpack.c.bf16 %v3292_v27, %v3291_v26  ;;  %v3294_v30 = vld [vmem:[%s5642_s2 + $0xe8] sm:$0xff] }
  0x7d   : > { %v4299_v31 = vpack.c.bf16 %v3294_v30, %v3293_v29 }
  0x7f   : > { %3835 = vmatmul.mubr.msk.f32.gmra.mrb[6].mxu0 %vm245_vm1, %v3232_v12  ;;  %v1641_v12 = vld [vmem:[%s5642_s2 + $0x28] sm:$0xff] }
  0x80   : > { %3839 = vmatprep.mubr.msk.f32.mxu0 %vm245_vm1, %v4767_v3  ;;  %v3250_v3 = vld [vmem:[%s4763_s27 + $0x110] sm:$0xff] }
  0x83   : > { %3840 = vmatmul.mubr.msk.f32.vlgmr.msra.gmra.mrb[0].mxu0 %vm245_vm1, %v4770_v4  ;;  %v3283_v4 = vld [vmem:[%s5642_s2 + $0x90] sm:$0xff] }
  0x84   : > { %3852 = vmatpush3.msk.msra.mxu0 %vm270_vm0, %v3269_v16  ;;  %3842 = vmatprep.mubr.msk.f32.mxu0 %vm245_vm1, %v4782_v6  ;;  %v3284_v6 = vld [vmem:[%s5642_s2 + $0x98] sm:$0xff]  ;;  %v1640_v16 = vld [vmem:[%s5642_s2 + $0x20] sm:$0xff] }
  0x85   : > { %4276 = vmatprep.subr.bf16.mxu0 %v4275_v18 }
  0x87   : > { %3843 = vmatmul.mubr.msk.f32.gmra.mrb[2].mxu0 %vm245_vm1, %v4785_v7  ;;  %v4279_v7 = vpack.c.bf16 %v3284_v6, %v3283_v4 }
  0x88   : > { %3845 = vmatprep.mubr.msk.f32.mxu0 %vm245_vm1, %v4793_v8  ;;  %v3285_v8 = vld [vmem:[%s5642_s2 + $0xa0] sm:$0xff] }
  0x8b   : > { %3846 = vmatmul.mubr.msk.f32.gmra.mrb[4].mxu0 %vm245_vm1, %v4796_v9  ;;  %v3286_v9 = vld [vmem:[%s5642_s2 + $0xa8] sm:$0xff] }
  0x8c   : > { %3848 = vmatprep.mubr.msk.f32.mxu0 %vm245_vm1, %v4803_v10  ;;  %v4283_v10 = vpack.c.bf16 %v3286_v9, %v3285_v8  ;;  %v4315_v8 = vpack.c.bf16 %v1641_v12, %v1640_v16 }
  0x8f   : > { %3849 = vmatmul.mubr.msk.f32.gmra.mrb[6].mxu0 %vm245_vm1, %v3250_v3 }
  0x90   : > { %3853 = vmatprep.mubr.msk.f32.mxu0 %vm245_vm1, %v4882_v35  ;;  %v4359_v35 = vpack.c.bf16 %v3308_v34, %v3307_v33  ;;  %v3317_v33 = vld [vmem:[%s5642_s2 + $0x1a0] sm:$0xff]  ;;  %v3318_v34 = vld [vmem:[%s5642_s2 + $0x1a8] sm:$0xff] }
  0x92   : > { %4360 = vmatprep.subr.bf16.mxu1 %v4359_v35 }
  0x93   : > { %3854 = vmatmul.mubr.msk.f32.vlgmr.msra.gmra.mrb[0].mxu0 %vm245_vm1, %v4885_v36  ;;  %v3295_v36 = vld [vmem:[%s5642_s2 + $0xf0] sm:$0xff]  ;;  %4362 = vmatpush3.bf16.msra.mxu1 %v4359_v35  ;;  %v4319_v35 = vpack.c.bf16 %v1643_v23, %v1642_v22  ;;  %v3333_v23 = vld [vmem:[%s5642_s2 + $0x220] sm:$0xff] }
  0x94   : > { %3856 = vmatprep.mubr.msk.f32.mxu0 %vm245_vm1, %v4896_v39  ;;  %4278 = vmatpush3.bf16.msra.mxu0 %v4275_v18  ;;  %v4303_v38 = vpack.c.bf16 %v3296_v37, %v3295_v36  ;;  %v3309_v39 = vld [vmem:[%s5642_s2 + $0x160] sm:$0xff] }
  0x95   : > { %4280 = vmatprep.subr.bf16.mxu0 %v4279_v7 }
  0x97   : > { %3857 = vmatmul.mubr.msk.f32.gmra.mrb[2].mxu0 %vm245_vm1, %v4899_v40  ;;  %v3310_v40 = vld [vmem:[%s5642_s2 + $0x168] sm:$0xff] }
  0x98   : > { %3859 = vmatprep.mubr.msk.f32.mxu0 %vm245_vm1, %v4907_v41  ;;  %4282 = vmatpush3.bf16.msra.mxu0 %v4279_v7  ;;  %v1636_v41 = vld [vmem:[%s5642_s2] sm:$0xff] }
  0x99   : > { %4284 = vmatprep.subr.bf16.mxu0 %v4283_v10 }
  0x9b   : > { %3860 = vmatmul.mubr.msk.f32.gmra.mrb[4].mxu0 %vm245_vm1, %v4910_v42  ;;  %v4363_v42 = vpack.c.bf16 %v3310_v40, %v3309_v39  ;;  %v1645_v39 = vld [vmem:[%s5642_s2 + $0x48] sm:$0xff] }
  0x9c   : > { %3862 = vmatprep.mubr.msk.f32.mxu0 %vm245_vm1, %v4917_v43  ;;  %4286 = vmatpush3.bf16.msra.mxu0 %v4283_v10  ;;  %v1637_v43 = vld [vmem:[%s5642_s2 + $0x8] sm:$0xff]  ;;  %v3315_v10 = vld [vmem:[%s5642_s2 + $0x190] sm:$0xff] }
  0x9d   : > { %4288 = vmatprep.subr.bf16.mxu0 %v4287_v21  ;;  %v4307_v45 = vpack.c.bf16 %v1637_v43, %v1636_v41  ;;  %4364 = vmatprep.subr.bf16.mxu1 %v4363_v42  ;;  %v4375_v29 = vpack.c.bf16 %v3316_v19, %v3315_v10  ;;  %v3331_v10 = vld [vmem:[%s5642_s2 + $0x210] sm:$0xff]  ;;  %v3332_v19 = vld [vmem:[%s5642_s2 + $0x218] sm:$0xff] }
  0x9e   : > { %4366 = vmatpush3.bf16.msra.mxu1 %v4363_v42  ;;  %v4379_v42 = vpack.c.bf16 %v3318_v34, %v3317_v33  ;;  %v4407_v22 = vpack.c.bf16 %v3332_v19, %v3331_v10  ;;  %v3336_v33 = vld [vmem:[%s5642_s2 + $0x238] sm:$0xff]  ;;  %v3355_v19 = vld [vmem:[%s5642_s2 + $0x2d0] sm:$0xff] }
  0x9f   : > { %3863 = vmatmul.mubr.msk.f32.gmra.mrb[6].mxu0 %vm245_vm1, %v3268_v24  ;;  %4368 = vmatprep.subr.bf16.mxu1 %v4367_v48 }
  0xa0   : > { %4290 = vmatpush3.bf16.msra.mxu0 %v4287_v21  ;;  %3897 = vmatprep.mubr.f32.mxu0 %v1652_v44  ;;  %v3319_v44 = vld [vmem:[%s5642_s2 + $0x1b0] sm:$0xff] }
  0xa1   : > { %4292 = vmatprep.subr.bf16.mxu0 %v4291_v25 }
  0xa2   : > { %4370 = vmatpush3.bf16.msra.mxu1 %v4367_v48  ;;  %v1646_v48 = vld [vmem:[%s5642_s2 + $0x50] sm:$0xff] }
  0xa3   : > { %4372 = vmatprep.subr.bf16.mxu1 %v5136_v51 }
  0xa4   : > { %4294 = vmatpush3.bf16.msra.mxu0 %v4291_v25 }
  0xa5   : > { %4296 = vmatprep.subr.bf16.mxu0 %v4295_v28 }
  0xa8   : > { %4298 = vmatpush3.bf16.msra.mxu0 %v4295_v28 }
  0xa9   : > { %4300 = vmatprep.subr.bf16.mxu0 %v4299_v31 }
  0xac   : > { %4302 = vmatpush3.bf16.msra.mxu0 %v4299_v31 }
  0xad   : > { %4304 = vmatprep.subr.bf16.mxu0 %v4303_v38 }
  0xb0   : > { %4306 = vmatpush3.bf16.msra.mxu0 %v4303_v38  ;;  %v1644_v38 = vld [vmem:[%s5642_s2 + $0x40] sm:$0xff] }
  0xb1   : > { %4308 = vmatprep.subr.bf16.mxu0 %v4307_v45  ;;  %v4323_v46 = vpack.c.bf16 %v1645_v39, %v1644_v38  ;;  %v3338_v38 = vld [vmem:[%s5642_s2 + $0x248] sm:$0xff] }
 0x166   : > { %v3855_v54 = vpop.f32.mrb[0].mxu0 }
 0x167   : > { %v1571_v56 = vmul.f32 %v3855_v54, %v3279_v53  ;;  %v1518_v57 = vpop.f32.mrb[1].mxu0  ;;  %v4327_v54 = vpack.c.bf16 %v1647_v49, %v1646_v48  ;;  %v3341_v48 = vld [vmem:[%s5642_s2 + $0x260] sm:$0xff]  ;;  %v3342_v49 = vld [vmem:[%s5642_s2 + $0x268] sm:$0xff] }
 0x168   : > { %v1570_v58 = vmul.f32 %v3279_v53, %v1518_v57  ;;  %v1649_v57 = vld [vmem:[%s5642_s2 + $0x68] sm:$0xff] }
 0x169   : > { %v1584_v59 = vadd.f32 %v3280_v55, %v1571_v56  ;;  %v1648_v56 = vld [vmem:[%s5642_s2 + $0x60] sm:$0xff] }
 0x16a   : > { %v1583_v62 = vadd.f32 %v3280_v55, %v1570_v58  ;;  %v3858_v63 = vpop.f32.mrb[2].mxu0 }
 0x16b   : > { %v5151_v0 = vmax.f32 %v1584_v59, 0.0  ;;  %v1573_v1 = vmul.f32 %v3858_v63, %v3279_v53  ;;  %v1528_v2 = vpop.f32.mrb[3].mxu0 }
 0x16c   : > { %v5153_v5 = vmax.f32 %v1583_v62, 0.0  ;;  %v1572_v11 = vmul.f32 %v3279_v53, %v1528_v2  ;;  %v4331_v62 = vpack.c.bf16 %v1649_v57, %v1648_v56  ;;  %v1651_v2 = vld [vmem:[%s5642_s2 + $0x78] sm:$0xff]  ;;  %v3345_v56 = vld [vmem:[%s5642_s2 + $0x280] sm:$0xff]  ;;  %v3346_v57 = vld [vmem:[%s5642_s2 + $0x288] sm:$0xff] }
 0x16d   : > { %1621 = vst [vmem:[#allocation2 + $0x21] sm:$0xff] %v5151_v0  ;;  %v1586_v15 = vadd.f32 %v3280_v55, %v1573_v1  ;;  %v1650_v1 = vld [vmem:[%s5642_s2 + $0x70] sm:$0xff] }
 0x16e   : > { %1620 = vst [vmem:[#allocation2 + $0x11] sm:$0xff] %v5153_v5  ;;  %v1585_v13 = vadd.f32 %v3280_v55, %v1572_v11  ;;  %v3861_v17 = vpop.f32.mrb[4].mxu0  ;;  %3898 = vmatmul.mubr.f32.vlgmr.msra.gmra.mrb[8].mxu0 %v5153_v5  ;;  %v4391_v11 = vpack.c.bf16 %v3324_v61, %v3323_v60  ;;  %v4335_v16 = vpack.c.bf16 %v1651_v2, %v1650_v1  ;;  %v3347_v60 = vld [vmem:[%s5642_s2 + $0x290] sm:$0xff]  ;;  %v3348_v61 = vld [vmem:[%s5642_s2 + $0x298] sm:$0xff]  ;;  %v3350_v1 = vld [vmem:[%s5642_s2 + $0x2a8] sm:$0xff] }
 0x16f   : > { %v5164_v18 = vmax.f32 %v1586_v15, 0.0  ;;  %v1575_v3 = vmul.f32 %v3861_v17, %v3279_v53  ;;  %v1538_v4 = vpop.f32.mrb[5].mxu0  ;;  %4310 = vmatpush3.bf16.msra.mxu0 %v4307_v45  ;;  %3900 = vmatprep.mubr.f32.mxu0 %v5151_v0  ;;  %v3320_v45 = vld [vmem:[%s5642_s2 + $0x1b8] sm:$0xff]  ;;  %v3326_v15 = vld [vmem:[%s5642_s2 + $0x1e8] sm:$0xff]  ;;  %v3411_v2 = vld [vmem:[%s4763_s27 + $0x1b0] sm:$0xff] }
 0x170   : > { %v5167_v6 = vmax.f32 %v1585_v13, 0.0  ;;  %v1574_v7 = vmul.f32 %v3279_v53, %v1538_v4  ;;  %4312 = vmatprep.subr.bf16.mxu0 %v4311_v14  ;;  %v4383_v50 = vpack.c.bf16 %v3320_v45, %v3319_v44  ;;  %v3327_v13 = vld [vmem:[%s5642_s2 + $0x1f0] sm:$0xff]  ;;  %v3328_v17 = vld [vmem:[%s5642_s2 + $0x1f8] sm:$0xff]  ;;  %v3329_v4 = vld [vmem:[%s5642_s2 + $0x200] sm:$0xff] }
 0x171   : > { %1623 = vst [vmem:[#allocation2 + $0x41] sm:$0xff] %v5164_v18  ;;  %v1588_v9 = vadd.f32 %v3280_v55, %v1575_v3  ;;  %v4399_v3 = vpack.c.bf16 %v3328_v17, %v3327_v13  ;;  %v3339_v44 = vld [vmem:[%s5642_s2 + $0x250] sm:$0xff]  ;;  %v3340_v45 = vld [vmem:[%s5642_s2 + $0x258] sm:$0xff]  ;;  %v3414_v13 = vld [vmem:[%s4763_s27 + $0x1e0] sm:$0xff] }
 0x172   : > { %1622 = vst [vmem:[#allocation2 + $0x31] sm:$0xff] %v5167_v6  ;;  %v1587_v20 = vadd.f32 %v3280_v55, %v1574_v7  ;;  %v3864_v21 = vpop.f32.mrb[6].mxu0  ;;  %3901 = vmatmul.mubr.f32.gmra.mrb[10].mxu0 %v5167_v6  ;;  %v3330_v7 = vld [vmem:[%s5642_s2 + $0x208] sm:$0xff] }
 0x173   : > { %v5184_v24 = vmax.f32 %v1588_v9, 0.0  ;;  %v1577_v25 = vmul.f32 %v3864_v21, %v3279_v53  ;;  %v1548_v26 = vpop.f32.mrb[7].mxu0  ;;  %4314 = vmatpush3.bf16.msra.mxu0 %v4311_v14  ;;  %3903 = vmatprep.mubr.f32.mxu0 %v5164_v18  ;;  %v3325_v14 = vld [vmem:[%s5642_s2 + $0x1e0] sm:$0xff]  ;;  %v4403_v9 = vpack.c.bf16 %v3330_v7, %v3329_v4  ;;  %v3354_v4 = vld [vmem:[%s5642_s2 + $0x2c8] sm:$0xff]  ;;  %v3415_v7 = vld [vmem:[%s4763_s27 + $0x1f0] sm:$0xff] }
 0x174   : > { %v5187_v27 = vmax.f32 %v1587_v20, 0.0  ;;  %v1576_v28 = vmul.f32 %v3279_v53, %v1548_v26  ;;  %4316 = vmatprep.subr.bf16.mxu0 %v4315_v8  ;;  %v5200_v37 = vld [vmem:[#allocation2 + $0x22] sm:$0xff]  ;;  %v4395_v12 = vpack.c.bf16 %v3326_v15, %v3325_v14  ;;  %v3351_v15 = vld [vmem:[%s5642_s2 + $0x2b0] sm:$0xff] }
 0x175   : > { %1625 = vst [vmem:[#allocation2 + $0x61] sm:$0xff] %v5184_v24  ;;  %v1590_v30 = vadd.f32 %v3280_v55, %v1577_v25  ;;  %v5190_v31 = vld [vmem:[#allocation2 + $0x12] sm:$0xff]  ;;  %v3322_v53 = vld [vmem:[%s5642_s2 + $0x1c8] sm:$0xff] }
 0x176   : > { %1624 = vst [vmem:[#allocation2 + $0x51] sm:$0xff] %v5187_v27  ;;  %v1589_v36 = vadd.f32 %v3280_v55, %v1576_v28  ;;  %3986 = vmatmul.mubr.f32.vlgmr.msra.gmra.mrb[0].mxu1 %v5190_v31  ;;  %3904 = vmatmul.mubr.f32.gmra.mrb[12].mxu0 %v5187_v27  ;;  %v4387_v58 = vpack.c.bf16 %v3322_v53, %v3321_v52  ;;  %v2025_v63 = vld [vmem:[#allocation2 + $0x10] sm:$0xff]  ;;  %v3334_v25 = vld [vmem:[%s5642_s2 + $0x228] sm:$0xff]  ;;  %v3344_v53 = vld [vmem:[%s5642_s2 + $0x278] sm:$0xff] }
 0x177   : > { %v5209_v40 = vmax.f32 %v1590_v30, 0.0  ;;  %4374 = vmatpush3.bf16.msra.mxu1 %v5136_v51  ;;  %3988 = vmatprep.mubr.f32.mxu1 %v5200_v37  ;;  %v3335_v30 = vld [vmem:[%s5642_s2 + $0x230] sm:$0xff]  ;;  %v4427_v52 = vpack.c.bf16 %v3342_v49, %v3341_v48  ;;  %v3364_v48 = vld [vmem:[%s5642_s2 + $0x318] sm:$0xff] }
 0x178   : > { %v5213_v41 = vmax.f32 %v1589_v36, 0.0  ;;  %4376 = vmatprep.subr.bf16.mxu1 %v4375_v29  ;;  %4318 = vmatpush3.bf16.msra.mxu0 %v4315_v8  ;;  %v5227_v47 = vld [vmem:[#allocation2 + $0x42] sm:$0xff] }
 0x179   : > { %1627 = vst [vmem:[#allocation2 + $0x81] sm:$0xff] %v5209_v40  ;;  %v5216_v43 = vld [vmem:[#allocation2 + $0x32] sm:$0xff]  ;;  %3906 = vmatprep.mubr.f32.mxu0 %v5184_v24  ;;  %4320 = vmatprep.subr.bf16.mxu0 %v4319_v35  ;;  %v5289_v8 = vld [vmem:[#allocation2 + $0x20] sm:$0xff] }
 0x17a   : > { %1626 = vst [vmem:[#allocation2 + $0x71] sm:$0xff] %v5213_v41  ;;  %3989 = vmatmul.mubr.f32.gmra.mrb[2].mxu1 %v5216_v43  ;;  %3907 = vmatmul.mubr.f32.gmra.mrb[14].mxu0 %v5213_v41  ;;  %v5298_v20 = vld [vmem:[#allocation2 + $0x30] sm:$0xff]  ;;  %v5301_v21 = vld [vmem:[#allocation2 + $0x40] sm:$0xff] }
 0x17b   : > { %4378 = vmatpush3.bf16.msra.mxu1 %v4375_v29  ;;  %3991 = vmatprep.mubr.f32.mxu1 %v5227_v47  ;;  %v4411_v29 = vpack.c.bf16 %v3334_v25, %v3333_v23  ;;  %v3337_v36 = vld [vmem:[%s5642_s2 + $0x240] sm:$0xff]  ;;  %v3417_v23 = vld [vmem:[%s4763_s27 + $0x210] sm:$0xff] }
 0x17c   : > { %4380 = vmatprep.subr.bf16.mxu1 %v4379_v42  ;;  %4322 = vmatpush3.bf16.msra.mxu0 %v4319_v35  ;;  %v5247_v55 = vld [vmem:[#allocation2 + $0x62] sm:$0xff]  ;;  %v4415_v35 = vpack.c.bf16 %v3336_v33, %v3335_v30  ;;  %v4419_v39 = vpack.c.bf16 %v3338_v38, %v3337_v36  ;;  %v3360_v36 = vld [vmem:[%s5642_s2 + $0x2f8] sm:$0xff] }
 0x17d   : > { %v5237_v51 = vld [vmem:[#allocation2 + $0x52] sm:$0xff]  ;;  %4324 = vmatprep.subr.bf16.mxu0 %v4323_v46  ;;  %3941 = vmatprep.mubr.f32.mxu0 %v4709_v32  ;;  %v5315_v28 = vld [vmem:[#allocation2 + $0x60] sm:$0xff]  ;;  %v3358_v33 = vld [vmem:[%s5642_s2 + $0x2e8] sm:$0xff] }
 0x17e   : > { %3992 = vmatmul.mubr.f32.gmra.mrb[4].mxu1 %v5237_v51  ;;  %v5312_v26 = vld [vmem:[#allocation2 + $0x50] sm:$0xff]  ;;  %v3418_v25 = vld [vmem:[%s4763_s27 + $0x220] sm:$0xff] }
 0x17f   : > { %4382 = vmatpush3.bf16.msra.mxu1 %v4379_v42  ;;  %3994 = vmatprep.mubr.f32.mxu1 %v5247_v55  ;;  %v3357_v30 = vld [vmem:[%s5642_s2 + $0x2e0] sm:$0xff] }
 0x180   : > { %4384 = vmatprep.subr.bf16.mxu1 %v4383_v50  ;;  %4326 = vmatpush3.bf16.msra.mxu0 %v4323_v46  ;;  %v5337_v42 = vld [vmem:[#allocation2 + $0x80] sm:$0xff]  ;;  %v4423_v46 = vpack.c.bf16 %v3340_v45, %v3339_v44  ;;  %v3362_v44 = vld [vmem:[%s5642_s2 + $0x308] sm:$0xff] }
 0x181   : > { %v5256_v59 = vld [vmem:[#allocation2 + $0x72] sm:$0xff]  ;;  %4328 = vmatprep.subr.bf16.mxu0 %v4327_v54 }
 0x182   : > { %3995 = vmatmul.mubr.f32.gmra.mrb[6].mxu1 %v5256_v59  ;;  %v5326_v34 = vld [vmem:[#allocation2 + $0x70] sm:$0xff] }
 0x183   : > { %4386 = vmatpush3.bf16.msra.mxu1 %v4383_v50  ;;  %4029 = vmatprep.mubr.f32.mxu1 %v2025_v63  ;;  %v2888_v50 = vld [vmem:[%s5643_s3] sm:$0xf] }
 0x184   : > { %4388 = vmatprep.subr.bf16.mxu1 %v4387_v58  ;;  %4330 = vmatpush3.bf16.msra.mxu0 %v4327_v54 }
 0x185   : > { %4332 = vmatprep.subr.bf16.mxu0 %v4331_v62 }
 0x187   : > { %4390 = vmatpush3.bf16.msra.mxu1 %v4387_v58  ;;  %v4435_v58 = vpack.c.bf16 %v3346_v57, %v3345_v56  ;;  %v3369_v57 = vld [vmem:[%s5642_s2 + $0x340] sm:$0xff] }
 0x188   : > { %4392 = vmatprep.subr.bf16.mxu1 %v4391_v11  ;;  %4334 = vmatpush3.bf16.msra.mxu0 %v4331_v62  ;;  %v4439_v62 = vpack.c.bf16 %v3348_v61, %v3347_v60  ;;  %v5472_v61 = vld [vmem:[#allocation2 + $0x82] sm:$0xff] }
 0x189   : > { %4336 = vmatprep.subr.bf16.mxu0 %v4335_v16 }
 0x18b   : > { %4394 = vmatpush3.bf16.msra.mxu1 %v4391_v11  ;;  %v3412_v11 = vld [vmem:[%s4763_s27 + $0x1c0] sm:$0xff] }
 0x18c   : > { %4396 = vmatprep.subr.bf16.mxu1 %v4395_v12  ;;  %4338 = vmatpush3.bf16.msra.mxu0 %v4335_v16  ;;  %v3352_v16 = vld [vmem:[%s5642_s2 + $0x2b8] sm:$0xff] }
 0x18d   : > { %4261 = vmatprep.subr.msk.mxu0 %vm270_vm0, %v2888_v50  ;;  %v4447_v17 = vpack.c.bf16 %v3352_v16, %v3351_v15  ;;  %v3375_v15 = vld [vmem:[%s5642_s2 + $0x370] sm:$0xff] }
 0x18f   : > { %4398 = vmatpush3.bf16.msra.mxu1 %v4395_v12  ;;  %3942 = vmatmul.mubr.f32.vlgmr.msra.gmra.mrb[8].mxu0 %v2025_v63  ;;  %v3349_v63 = vld [vmem:[%s5642_s2 + $0x2a0] sm:$0xff]  ;;  %v3413_v12 = vld [vmem:[%s4763_s27 + $0x1d0] sm:$0xff] }
 0x190   : > { %4400 = vmatprep.subr.bf16.mxu1 %v4399_v3  ;;  %3944 = vmatprep.mubr.f32.mxu0 %v5289_v8  ;;  %v4443_v14 = vpack.c.bf16 %v3350_v1, %v3349_v63  ;;  %v3372_v63 = vld [vmem:[%s5642_s2 + $0x358] sm:$0xff] }
 0x191   : > { %4262 = vmatpush3.msk.msra.mxu0 %vm270_vm0, %v2888_v50  ;;  %v3365_v50 = vld [vmem:[%s5642_s2 + $0x320] sm:$0xff] }
 0x193   : > { %4402 = vmatpush3.bf16.msra.mxu1 %v4399_v3  ;;  %3945 = vmatmul.mubr.f32.gmra.mrb[10].mxu0 %v5298_v20  ;;  %v3353_v3 = vld [vmem:[%s5642_s2 + $0x2c0] sm:$0xff] }
 0x194   : > { %4404 = vmatprep.subr.bf16.mxu1 %v4403_v9  ;;  %3947 = vmatprep.mubr.f32.mxu0 %v5301_v21  ;;  %v4451_v10 = vpack.c.bf16 %v3354_v4, %v3353_v3  ;;  %v3379_v3 = vld [vmem:[%s5642_s2 + $0x390] sm:$0xff]  ;;  %v3380_v4 = vld [vmem:[%s5642_s2 + $0x398] sm:$0xff] }
 0x196   : > { %4030 = vmatmul.mubr.f32.vlgmr.msra.gmra.mrb[0].mxu1 %v5289_v8 }
 0x197   : > { %4032 = vmatprep.mubr.f32.mxu1 %v5298_v20  ;;  %4406 = vmatpush3.bf16.msra.mxu1 %v4403_v9  ;;  %v3416_v9 = vld [vmem:[%s4763_s27 + $0x200] sm:$0xff] }
 0x198   : > { %4408 = vmatprep.subr.bf16.mxu1 %v4407_v22  ;;  %3948 = vmatmul.mubr.f32.gmra.mrb[12].mxu0 %v5312_v26 }
 0x199   : > { %3950 = vmatprep.mubr.f32.mxu0 %v5315_v28 }
 0x19a   : > { %4033 = vmatmul.mubr.f32.gmra.mrb[2].mxu1 %v5301_v21 }
 0x19b   : > { %4035 = vmatprep.mubr.f32.mxu1 %v5312_v26  ;;  %4410 = vmatpush3.bf16.msra.mxu1 %v4407_v22  ;;  %v3356_v22 = vld [vmem:[%s5642_s2 + $0x2d8] sm:$0xff] }
 0x19c   : > { %4412 = vmatprep.subr.bf16.mxu1 %v4411_v29  ;;  %3951 = vmatmul.mubr.f32.gmra.mrb[14].mxu0 %v5326_v34 }
 0x19d   : > { %4263 = vmatprep.mubr.msk.f32.mxu0 %vm245_vm1, %v3411_v2  ;;  %v3373_v2 = vld [vmem:[%s5642_s2 + $0x360] sm:$0xff] }
 0x19e   : > { %4036 = vmatmul.mubr.f32.gmra.mrb[4].mxu1 %v5315_v28 }
 0x19f   : > { %4038 = vmatprep.mubr.f32.mxu1 %v5326_v34  ;;  %4414 = vmatpush3.bf16.msra.mxu1 %v4411_v29  ;;  %v4455_v29 = vpack.c.bf16 %v3356_v22, %v3355_v19  ;;  %v3383_v22 = vld [vmem:[%s5642_s2 + $0x3b0] sm:$0xff] }
 0x1a0   : > { %4416 = vmatprep.subr.bf16.mxu1 %v4415_v35  ;;  %4264 = vmatmul.mubr.msk.f32.vlgmr.msra.gmra.mrb[16].mxu0 %vm245_vm1, %v3412_v11  ;;  %v3374_v11 = vld [vmem:[%s5642_s2 + $0x368] sm:$0xff] }
 0x1a1   : > { %4266 = vmatprep.mubr.msk.f32.mxu0 %vm245_vm1, %v3413_v12  ;;  %v3377_v12 = vld [vmem:[%s5642_s2 + $0x380] sm:$0xff] }
 0x1a2   : > { %4039 = vmatmul.mubr.f32.gmra.mrb[6].mxu1 %v5337_v42 }
 0x1a3   : > { %4418 = vmatpush3.bf16.msra.mxu1 %v4415_v35  ;;  %4073 = vmatprep.mubr.f32.mxu1 %v5153_v5  ;;  %v3343_v5 = vld [vmem:[%s5642_s2 + $0x270] sm:$0xff]  ;;  %v4459_v35 = vpack.c.bf16 %v3358_v33, %v3357_v30  ;;  %v3390_v30 = vld [vmem:[%s5642_s2 + $0x3e8] sm:$0xff] }
 0x1a4   : > { %4420 = vmatprep.subr.bf16.mxu1 %v4419_v39  ;;  %v4431_v54 = vpack.c.bf16 %v3344_v53, %v3343_v5  ;;  %4267 = vmatmul.mubr.msk.f32.gmra.mrb[18].mxu0 %vm245_vm1, %v3414_v13  ;;  %v3367_v53 = vld [vmem:[%s5642_s2 + $0x330] sm:$0xff]  ;;  %v3378_v13 = vld [vmem:[%s5642_s2 + $0x388] sm:$0xff] }
 0x1a5   : > { %4269 = vmatprep.mubr.msk.f32.mxu0 %vm245_vm1, %v3415_v7  ;;  %v4503_v7 = vpack.c.bf16 %v3380_v4, %v3379_v3  ;;  %v3428_v4 = vld [vmem:[%s5644_s4 + $0x4] ss:$0 sm:$0xff] }
 0x1a7   : > { %4422 = vmatpush3.bf16.msra.mxu1 %v4419_v39  ;;  %v3361_v39 = vld [vmem:[%s5642_s2 + $0x300] sm:$0xff] }
 0x1a8   : > { %4424 = vmatprep.subr.bf16.mxu1 %v4423_v46  ;;  %4270 = vmatmul.mubr.msk.f32.gmra.mrb[20].mxu0 %vm245_vm1, %v3416_v9  ;;  %v4467_v45 = vpack.c.bf16 %v3362_v44, %v3361_v39  ;;  %v3381_v9 = vld [vmem:[%s5642_s2 + $0x3a0] sm:$0xff]  ;;  %v3395_v39 = vld [vmem:[%s5642_s2 + $0x410] sm:$0xff]  ;;  %v3396_v44 = vld [vmem:[%s5642_s2 + $0x418] sm:$0xff] }
 0x1a9   : > { %4272 = vmatprep.mubr.msk.f32.mxu0 %vm245_vm1, %v3417_v23  ;;  %v3384_v23 = vld [vmem:[%s5642_s2 + $0x3b8] sm:$0xff] }
 0x1ab   : > { %4426 = vmatpush3.bf16.msra.mxu1 %v4423_v46  ;;  %v3363_v46 = vld [vmem:[%s5642_s2 + $0x310] sm:$0xff] }
 0x1ac   : > { %4428 = vmatprep.subr.bf16.mxu1 %v4427_v52  ;;  %4273 = vmatmul.mubr.msk.f32.gmra.mrb[22].mxu0 %vm245_vm1, %v3418_v25  ;;  %v4471_v49 = vpack.c.bf16 %v3364_v48, %v3363_v46  ;;  %v3386_v25 = vld [vmem:[%s5642_s2 + $0x3c8] sm:$0xff]  ;;  %v3397_v46 = vld [vmem:[%s5642_s2 + $0x420] sm:$0xff] }
 0x1ad   : > { %v3398_v48 = vld [vmem:[%s5642_s2 + $0x428] sm:$0xff] }
 0x1af   : > { %4430 = vmatpush3.bf16.msra.mxu1 %v4427_v52  ;;  %v3366_v52 = vld [vmem:[%s5642_s2 + $0x328] sm:$0xff] }
 0x1b0   : > { %4432 = vmatprep.subr.bf16.mxu1 %v4431_v54  ;;  %v4475_v5 = vpack.c.bf16 %v3366_v52, %v3365_v50  ;;  %v3399_v50 = vld [vmem:[%s5642_s2 + $0x430] sm:$0xff]  ;;  %v3400_v52 = vld [vmem:[%s5642_s2 + $0x438] sm:$0xff] }
 0x1b3   : > { %4434 = vmatpush3.bf16.msra.mxu1 %v4431_v54  ;;  %v3368_v54 = vld [vmem:[%s5642_s2 + $0x338] sm:$0xff] }
 0x1b4   : > { %4436 = vmatprep.subr.bf16.mxu1 %v4435_v58  ;;  %v4479_v56 = vpack.c.bf16 %v3368_v54, %v3367_v53  ;;  %v2585_v53 = vld [vmem:[#allocation2 + $0x91] sm:$0xff] }
 0x1b5   : > { %v3404_v54 = vld [vmem:[%s5642_s2 + $0x458] sm:$0xff] }
 0x1b6   : > { %4074 = vmatmul.mubr.f32.vlgmr.msra.gmra.mrb[0].mxu1 %v5151_v0 }
 0x1b7   : > { %4076 = vmatprep.mubr.f32.mxu1 %v5167_v6  ;;  %4438 = vmatpush3.bf16.msra.mxu1 %v4435_v58  ;;  %v3370_v58 = vld [vmem:[%s5642_s2 + $0x348] sm:$0xff] }
 0x1b8   : > { %4440 = vmatprep.subr.bf16.mxu1 %v4439_v62  ;;  %v4483_v60 = vpack.c.bf16 %v3370_v58, %v3369_v57  ;;  %v3407_v58 = vld [vmem:[%s5642_s2 + $0x470] sm:$0xff] }
 0x1ba   : > { %4077 = vmatmul.mubr.f32.gmra.mrb[2].mxu1 %v5164_v18 }
 0x1bb   : > { %4079 = vmatprep.mubr.f32.mxu1 %v5187_v27  ;;  %4442 = vmatpush3.bf16.msra.mxu1 %v4439_v62  ;;  %v3371_v62 = vld [vmem:[%s5642_s2 + $0x350] sm:$0xff] }
 0x1bc   : > { %4444 = vmatprep.subr.bf16.mxu1 %v4443_v14  ;;  %v4487_v1 = vpack.c.bf16 %v3372_v63, %v3371_v62  ;;  %v2723_v62 = vld [vmem:[#allocation2 + $0x92] sm:$0xff] }
 0x1be   : > { %4080 = vmatmul.mubr.f32.gmra.mrb[4].mxu1 %v5184_v24 }
 0x1bf   : > { %4082 = vmatprep.mubr.f32.mxu1 %v5213_v41  ;;  %4446 = vmatpush3.bf16.msra.mxu1 %v4443_v14  ;;  %v4491_v14 = vpack.c.bf16 %v3374_v11, %v3373_v2 }
 0x1c0   : > { %4448 = vmatprep.subr.bf16.mxu1 %v4447_v17 }
 0x1c2   : > { %4083 = vmatmul.mubr.f32.gmra.mrb[6].mxu1 %v5209_v40 }
 0x1c3   : > { %4450 = vmatpush3.bf16.msra.mxu1 %v4447_v17  ;;  %4117 = vmatprep.mubr.f32.mxu1 %v5190_v31  ;;  %v3359_v31 = vld [vmem:[%s5642_s2 + $0x2f0] sm:$0xff]  ;;  %v4499_v17 = vpack.c.bf16 %v3378_v13, %v3377_v12 }
 0x1c4   : > { %4452 = vmatprep.subr.bf16.mxu1 %v4451_v10  ;;  %v4463_v38 = vpack.c.bf16 %v3360_v36, %v3359_v31  ;;  %v3393_v31 = vld [vmem:[%s5642_s2 + $0x400] sm:$0xff]  ;;  %v3394_v36 = vld [vmem:[%s5642_s2 + $0x408] sm:$0xff] }
 0x1c7   : > { %4454 = vmatpush3.bf16.msra.mxu1 %v4451_v10  ;;  %v3382_v10 = vld [vmem:[%s5642_s2 + $0x3a8] sm:$0xff] }
 0x1c8   : > { %4456 = vmatprep.subr.bf16.mxu1 %v4455_v29  ;;  %v4507_v19 = vpack.c.bf16 %v3382_v10, %v3381_v9 }
 0x1cb   : > { %4458 = vmatpush3.bf16.msra.mxu1 %v4455_v29  ;;  %v3388_v29 = vld [vmem:[%s5642_s2 + $0x3d8] sm:$0xff] }
 0x1cc   : > { %4460 = vmatprep.subr.bf16.mxu1 %v4459_v35 }
 0x1cf   : > { %4462 = vmatpush3.bf16.msra.mxu1 %v4459_v35 }
 0x1d0   : > { %4464 = vmatprep.subr.bf16.mxu1 %v4463_v38 }
 0x1d3   : > { %4466 = vmatpush3.bf16.msra.mxu1 %v4463_v38  ;;  %v4531_v38 = vpack.c.bf16 %v3394_v36, %v3393_v31 }
 0x1d4   : > { %4468 = vmatprep.subr.bf16.mxu1 %v4467_v45 }
 0x1d6   : > { %4118 = vmatmul.mubr.f32.vlgmr.msra.gmra.mrb[0].mxu1 %v5200_v37 }
 0x1d7   : > { %4120 = vmatprep.mubr.f32.mxu1 %v5216_v43  ;;  %4470 = vmatpush3.bf16.msra.mxu1 %v4467_v45  ;;  %v4535_v45 = vpack.c.bf16 %v3396_v44, %v3395_v39 }
 0x1d8   : > { %4472 = vmatprep.subr.bf16.mxu1 %v4471_v49 }
 0x1da   : > { %4121 = vmatmul.mubr.f32.gmra.mrb[2].mxu1 %v5227_v47 }
 0x1db   : > { %4123 = vmatprep.mubr.f32.mxu1 %v5237_v51  ;;  %4474 = vmatpush3.bf16.msra.mxu1 %v4471_v49  ;;  %v4539_v49 = vpack.c.bf16 %v3398_v48, %v3397_v46 }
 0x1dc   : > { %4476 = vmatprep.subr.bf16.mxu1 %v4475_v5 }
 0x1de   : > { %4124 = vmatmul.mubr.f32.gmra.mrb[4].mxu1 %v5247_v55 }
 0x1df   : > { %4126 = vmatprep.mubr.f32.mxu1 %v5256_v59  ;;  %4478 = vmatpush3.bf16.msra.mxu1 %v4475_v5  ;;  %v3402_v5 = vld [vmem:[%s5642_s2 + $0x448] sm:$0xff] }
 0x1e0   : > { %4480 = vmatprep.subr.bf16.mxu1 %v4479_v56 }
 0x1e2   : > { %4127 = vmatmul.mubr.f32.gmra.mrb[6].mxu1 %v5472_v61 }
 0x1e3   : > { %4482 = vmatpush3.bf16.msra.mxu1 %v4479_v56  ;;  %4161 = vmatprep.mubr.f32.mxu1 %v5289_v8  ;;  %v3376_v8 = vld [vmem:[%s5642_s2 + $0x378] sm:$0xff]  ;;  %v3406_v56 = vld [vmem:[%s5642_s2 + $0x468] sm:$0xff] }
 0x1e4   : > { %4484 = vmatprep.subr.bf16.mxu1 %v4483_v60  ;;  %v4495_v16 = vpack.c.bf16 %v3376_v8, %v3375_v15 }
 0x1e7   : > { %4486 = vmatpush3.bf16.msra.mxu1 %v4483_v60 }
 0x1e8   : > { %4488 = vmatprep.subr.bf16.mxu1 %v4487_v1 }
 0x1eb   : > { %4490 = vmatpush3.bf16.msra.mxu1 %v4487_v1 }
 0x1ec   : > { %4492 = vmatprep.subr.bf16.mxu1 %v4491_v14 }
 0x1ef   : > { %4494 = vmatpush3.bf16.msra.mxu1 %v4491_v14 }
 0x1f0   : > { %4496 = vmatprep.subr.bf16.mxu1 %v4495_v16 }
 0x1f3   : > { %4498 = vmatpush3.bf16.msra.mxu1 %v4495_v16 }
 0x1f4   : > { %4500 = vmatprep.subr.bf16.mxu1 %v4499_v17 }
 0x1f6   : > { %4162 = vmatmul.mubr.f32.vlgmr.msra.gmra.mrb[0].mxu1 %v5298_v20  ;;  %v4511_v20 = vpack.c.bf16 %v3384_v23, %v3383_v22 }
 0x1f7   : > { %4164 = vmatprep.mubr.f32.mxu1 %v5301_v21  ;;  %4502 = vmatpush3.bf16.msra.mxu1 %v4499_v17  ;;  %v3385_v21 = vld [vmem:[%s5642_s2 + $0x3c0] sm:$0xff] }
 0x1f8   : > { %4504 = vmatprep.subr.bf16.mxu1 %v4503_v7 }
 0x1fa   : > { %4165 = vmatmul.mubr.f32.gmra.mrb[2].mxu1 %v5312_v26  ;;  %v4515_v26 = vpack.c.bf16 %v3386_v25, %v3385_v21 }
 0x1fb   : > { %4167 = vmatprep.mubr.f32.mxu1 %v5315_v28  ;;  %4506 = vmatpush3.bf16.msra.mxu1 %v4503_v7  ;;  %v3387_v28 = vld [vmem:[%s5642_s2 + $0x3d0] sm:$0xff] }
 0x1fc   : > { %4508 = vmatprep.subr.bf16.mxu1 %v4507_v19 }
 0x1fe   : > { %4168 = vmatmul.mubr.f32.gmra.mrb[4].mxu1 %v5326_v34  ;;  %v4519_v34 = vpack.c.bf16 %v3388_v29, %v3387_v28 }
 0x1ff   : > { %4170 = vmatprep.mubr.f32.mxu1 %v5337_v42  ;;  %4510 = vmatpush3.bf16.msra.mxu1 %v4507_v19  ;;  %v3389_v42 = vld [vmem:[%s5642_s2 + $0x3e0] sm:$0xff] }
 0x200   : > { %4512 = vmatprep.subr.bf16.mxu1 %v4511_v20  ;;  %v4523_v33 = vpack.c.bf16 %v3390_v30, %v3389_v42  ;;  %v3410_v19 = vld [vmem:[%s5644_s4 + $0x3] ss:$0 sm:$0xff] }
 0x202   : > { %4171 = vmatmul.mubr.f32.gmra.mrb[6].mxu1 %v4709_v32  ;;  %v3391_v32 = vld [vmem:[%s5642_s2 + $0x3f0] sm:$0xff] }
 0x203   : > { %4514 = vmatpush3.bf16.msra.mxu1 %v4511_v20  ;;  %4205 = vmatprep.mubr.f32.mxu1 %v5151_v0  ;;  %v3392_v0 = vld [vmem:[%s5642_s2 + $0x3f8] sm:$0xff] }
 0x204   : > { %4516 = vmatprep.subr.bf16.mxu1 %v4515_v26  ;;  %v4527_v35 = vpack.c.bf16 %v3392_v0, %v3391_v32 }
 0x207   : > { %4518 = vmatpush3.bf16.msra.mxu1 %v4515_v26 }
 0x208   : > { %4520 = vmatprep.subr.bf16.mxu1 %v4519_v34 }
 0x20b   : > { %4522 = vmatpush3.bf16.msra.mxu1 %v4519_v34  ;;  %v3429_v34 = vld [vmem:[%s5644_s4 + $0x5] ss:$0 sm:$0xff] }
 0x20c   : > { %4524 = vmatprep.subr.bf16.mxu1 %v4523_v33 }
 0x20f   : > { %4526 = vmatpush3.bf16.msra.mxu1 %v4523_v33 }
 0x210   : > { %4528 = vmatprep.subr.bf16.mxu1 %v4527_v35 }
 0x213   : > { %4530 = vmatpush3.bf16.msra.mxu1 %v4527_v35 }
 0x214   : > { %4532 = vmatprep.subr.bf16.mxu1 %v4531_v38 }
 0x216   : > { %4206 = vmatmul.mubr.f32.vlgmr.msra.gmra.mrb[0].mxu1 %v5167_v6  ;;  %v4543_v6 = vpack.c.bf16 %v3400_v52, %v3399_v50 }
 0x217   : > { %4208 = vmatprep.mubr.f32.mxu1 %v5164_v18  ;;  %4534 = vmatpush3.bf16.msra.mxu1 %v4531_v38  ;;  %v3401_v18 = vld [vmem:[%s5642_s2 + $0x440] sm:$0xff] }
 0x218   : > { %4536 = vmatprep.subr.bf16.mxu1 %v4535_v45 }
 0x21a   : > { %4209 = vmatmul.mubr.f32.gmra.mrb[2].mxu1 %v5187_v27  ;;  %v4547_v27 = vpack.c.bf16 %v3402_v5, %v3401_v18 }
 0x21b   : > { %4211 = vmatprep.mubr.f32.mxu1 %v5184_v24  ;;  %4538 = vmatpush3.bf16.msra.mxu1 %v4535_v45  ;;  %v3403_v24 = vld [vmem:[%s5642_s2 + $0x450] sm:$0xff] }
 0x21c   : > { %4540 = vmatprep.subr.bf16.mxu1 %v4539_v49 }
 0x21e   : > { %4212 = vmatmul.mubr.f32.gmra.mrb[4].mxu1 %v5213_v41  ;;  %v4551_v41 = vpack.c.bf16 %v3404_v54, %v3403_v24 }
 0x21f   : > { %4214 = vmatprep.mubr.f32.mxu1 %v5209_v40  ;;  %4542 = vmatpush3.bf16.msra.mxu1 %v4539_v49  ;;  %v3405_v40 = vld [vmem:[%s5642_s2 + $0x460] sm:$0xff] }
 0x220   : > { %4544 = vmatprep.subr.bf16.mxu1 %v4543_v6  ;;  %v4555_v57 = vpack.c.bf16 %v3406_v56, %v3405_v40 }
 0x222   : > { %4215 = vmatmul.mubr.f32.gmra.mrb[6].mxu1 %v2585_v53 }
 0x223   : > { %4546 = vmatpush3.bf16.msra.mxu1 %v4543_v6  ;;  %4249 = vmatprep.mubr.f32.mxu1 %v5200_v37  ;;  %v3408_v37 = vld [vmem:[%s5642_s2 + $0x478] sm:$0xff] }
 0x224   : > { %4548 = vmatprep.subr.bf16.mxu1 %v4547_v27  ;;  %v4559_v60 = vpack.c.bf16 %v3408_v37, %v3407_v58 }
 0x227   : > { %4550 = vmatpush3.bf16.msra.mxu1 %v4547_v27 }
 0x228   : > { %4552 = vmatprep.subr.bf16.mxu1 %v4551_v41 }
 0x22b   : > { %4554 = vmatpush3.bf16.msra.mxu1 %v4551_v41 }
 0x22c   : > { %4556 = vmatprep.subr.bf16.mxu1 %v4555_v57 }
 0x22f   : > { %4558 = vmatpush3.bf16.msra.mxu1 %v4555_v57 }
 0x230   : > { %4560 = vmatprep.subr.bf16.mxu1 %v4559_v60 }
 0x233   : > { %4562 = vmatpush3.bf16.msra.mxu1 %v4559_v60 }
 0x236   : > { %4250 = vmatmul.mubr.f32.vlgmr.msra.gmra.mrb[0].mxu1 %v5216_v43 }
 0x237   : > { %4252 = vmatprep.mubr.f32.mxu1 %v5227_v47 }
 0x23a   : > { %4253 = vmatmul.mubr.f32.gmra.mrb[2].mxu1 %v5237_v51 }
 0x23b   : > { %4255 = vmatprep.mubr.f32.mxu1 %v5247_v55 }
 0x23e   : > { %4256 = vmatmul.mubr.f32.gmra.mrb[4].mxu1 %v5256_v59 }
 0x23f   : > { %4258 = vmatprep.mubr.f32.mxu1 %v5472_v61  ;;  %v3409_v61 = vld [vmem:[%s5644_s4 + $0x2] ss:$0 sm:$0xff] }
 0x242   : > { %4259 = vmatmul.mubr.f32.gmra.mrb[6].mxu1 %v2723_v62 }
 0x262   : > { %v3943_v63 = vpop.f32.mrb[8].mxu0 }
 0x263   : > { %v1848_v1 = vpop.f32.mrb[9].mxu0 }
 0x266   : > { %v3946_v2 = vpop.f32.mrb[10].mxu0 }
 0x267   : > { %v1858_v11 = vpop.f32.mrb[11].mxu0 }
 0x26b   : > { %v3949_v14 = vpop.f32.mrb[12].mxu0 }
 0x26c   : > { %v1868_v15 = vpop.f32.mrb[13].mxu0 }
 0x26f   : > { %v3952_v8 = vpop.f32.mrb[14].mxu0 }
 0x270   : > { %v1878_v43 = vpop.f32.mrb[15].mxu0 }
 0x273   : > { %v4265_v16 = vpop.f32.mrb[16].mxu0 }
 0x274   : > { %v2982_v47 = vpop.f32.mrb[17].mxu0  ;;  %v3027_v23 = vmul.f32 %v4265_v16, %v3428_v4 }
 0x275   : > { %v3026_v25 = vmul.f32 %v3428_v4, %v2982_v47 }
 0x277   : > { %v4268_v12 = vpop.f32.mrb[18].mxu0 }
 0x278   : > { %v2992_v51 = vpop.f32.mrb[19].mxu0  ;;  %v3029_v0 = vmul.f32 %v4268_v12, %v3428_v4 }
 0x279   : > { %v3028_v38 = vmul.f32 %v3428_v4, %v2992_v51 }
 0x27b   : > { %v4271_v13 = vpop.f32.mrb[20].mxu0 }
 0x27c   : > { %v3002_v55 = vpop.f32.mrb[21].mxu0  ;;  %v3031_v5 = vmul.f32 %v4271_v13, %v3428_v4 }
 0x27d   : > { %v3030_v41 = vmul.f32 %v3428_v4, %v3002_v55 }
 0x27f   : > { %v4274_v17 = vpop.f32.mrb[22].mxu0 }
 0x280   : > { %v3012_v59 = vpop.f32.mrb[23].mxu0 }
 0x281   : > { %v3032_v47 = vmul.f32 %v3428_v4, %v3012_v59 }
 0x309   : > { %v4251_v3 = vpop.f32.mrb[0].mxu1 }
 0x30a   : > { %v4563_v7 = vadd.f32 %v4251_v3, %v3943_v63  ;;  %v2807_v9 = vpop.f32.mrb[1].mxu1 }
 0x30b   : > { %v4564_v10 = vadd.f32 %v2807_v9, %v1848_v1 }
 0x30c   : > { %v2860_v22 = vmul.f32 %v4563_v7, %v3409_v61 }
 0x30d   : > { %v2859_v20 = vmul.f32 %v4564_v10, %v3409_v61  ;;  %v4254_v21 = vpop.f32.mrb[2].mxu1 }
 0x30e   : > { %v2873_v26 = vadd.f32 %v3410_v19, %v2860_v22  ;;  %v4565_v28 = vadd.f32 %v4254_v21, %v3946_v2  ;;  %v2817_v29 = vpop.f32.mrb[3].mxu1 }
 0x30f   : > { %v2872_v42 = vadd.f32 %v3410_v19, %v2859_v20  ;;  %v4566_v30 = vadd.f32 %v2817_v29, %v1858_v11  ;;  %v3033_v11 = vmul.f32 %v4274_v17, %v3428_v4 }
 0x310   : > { %v3035_v33 = vadd.f32 %v3027_v23, %v2873_v26  ;;  %v2862_v32 = vmul.f32 %v4565_v28, %v3409_v61 }
 0x311   : > { %v3034_v35 = vadd.f32 %v3026_v25, %v2872_v42  ;;  %v2861_v31 = vmul.f32 %v4566_v30, %v3409_v61  ;;  %v4257_v36 = vpop.f32.mrb[4].mxu1 }
 0x312   : > { %v3048_v39 = vadd.f32 %v3429_v34, %v3035_v33  ;;  %v2875_v44 = vadd.f32 %v3410_v19, %v2862_v32  ;;  %v4567_v45 = vadd.f32 %v4257_v36, %v3949_v14  ;;  %v2827_v46 = vpop.f32.mrb[5].mxu1 }
 0x313   : > { %v3047_v48 = vadd.f32 %v3429_v34, %v3034_v35  ;;  %v2874_v49 = vadd.f32 %v3410_v19, %v2861_v31  ;;  %v4568_v50 = vadd.f32 %v2827_v46, %v1868_v15 }
 0x314   : > { %v3056_v52 = vmax.f32 %v3048_v39, 0.0  ;;  %v3037_v6 = vadd.f32 %v3029_v0, %v2875_v44  ;;  %v2864_v18 = vmul.f32 %v4567_v45, %v3409_v61 }
 0x315   : > { %v3055_v53 = vmax.f32 %v3047_v48, 0.0  ;;  %v3036_v27 = vadd.f32 %v3028_v38, %v2874_v49  ;;  %v2863_v24 = vmul.f32 %v4568_v50, %v3409_v61  ;;  %v4260_v54 = vpop.f32.mrb[6].mxu1 }
 0x316   : > { %3064 = vst [vmem:[%s5627_s9 + $0x8] sm:$0xff] %v3056_v52  ;;  %v3050_v40 = vadd.f32 %v3429_v34, %v3037_v6  ;;  %v2877_v56 = vadd.f32 %v3410_v19, %v2864_v18  ;;  %v4569_v57 = vadd.f32 %v4260_v54, %v3952_v8  ;;  %v2837_v58 = vpop.f32.mrb[7].mxu1 }
 0x317   : > { %3063 = vst [vmem:[%s5627_s9] sm:$0xff] %v3055_v53  ;;  %v3049_v37 = vadd.f32 %v3429_v34, %v3036_v27  ;;  %v2876_v60 = vadd.f32 %v3410_v19, %v2863_v24  ;;  %v4570_v62 = vadd.f32 %v2837_v58, %v1878_v43 }
 0x318   : > { %v3058_v63 = vmax.f32 %v3050_v40, 0.0  ;;  %v3039_v1 = vadd.f32 %v3031_v5, %v2877_v56  ;;  %v2866_v2 = vmul.f32 %v4569_v57, %v3409_v61 }
 0x319   : > { %v3057_v14 = vmax.f32 %v3049_v37, 0.0  ;;  %v3038_v15 = vadd.f32 %v3030_v41, %v2876_v60  ;;  %v2865_v16 = vmul.f32 %v4570_v62, %v3409_v61 }
 0x31a   : > { %3066 = vst [vmem:[%s5627_s9 + $0x18] sm:$0xff] %v3058_v63  ;;  %v3052_v12 = vadd.f32 %v3429_v34, %v3039_v1  ;;  %v2879_v8 = vadd.f32 %v3410_v19, %v2866_v2 }
 0x31b   : > { %3065 = vst [vmem:[%s5627_s9 + $0x10] sm:$0xff] %v3057_v14  ;;  %v3051_v51 = vadd.f32 %v3429_v34, %v3038_v15  ;;  %v2878_v13 = vadd.f32 %v3410_v19, %v2865_v16 }
 0x31c   : > { %v3060_v55 = vmax.f32 %v3052_v12, 0.0  ;;  %v3041_v43 = vadd.f32 %v3033_v11, %v2879_v8 }
 0x31d   : > { %v3059_v3 = vmax.f32 %v3051_v51, 0.0  ;;  %v3040_v7 = vadd.f32 %v3032_v47, %v2878_v13 }
 0x31e   : > { %3068 = vst [vmem:[%s5627_s9 + $0x28] sm:$0xff] %v3060_v55  ;;  %v3054_v9 = vadd.f32 %v3429_v34, %v3041_v43 }
 0x31f   : > { %3067 = vst [vmem:[%s5627_s9 + $0x20] sm:$0xff] %v3059_v3  ;;  %v3053_v17 = vadd.f32 %v3429_v34, %v3040_v7 }
 0x320   : > { %v3062_v10 = vmax.f32 %v3054_v9, 0.0 }
 0x321   : > { %v3061_v22 = vmax.f32 %v3053_v17, 0.0 }
 0x322   : > { %3070 = vst [vmem:[%s5627_s9 + $0x38] sm:$0xff] %v3062_v10 }
 0x323   : > { %3069 = vst [vmem:[%s5627_s9 + $0x30] sm:$0xff] %v3061_v22 }
 0x324 PF: > { %s15_s18 = sadd.s32 1, %s4707_s18  }
 0x325   : > { %p12_p4 = scmp.ge.s32.totalorder %s15_s18, 4  }
 0x327   :  { %14 = sbr.rel (!%p12_p4) target bundleno = 1 (0x1), region = 93 }

</bundles_post_ra>
